<compile_context>
chip_gen: v6e
topology: v6e:2x2x1
jax: 0.10.0
libtpu: 0.0.40
codegen_flags: <defaults>
</compile_context>

<pallas_src>
import math

import jax
import jax.numpy as jnp
from jax.experimental import pallas as pl
from jax.experimental.pallas import tpu as pltpu  # noqa: F401

T, N, F = 8, 2, 16           # time steps, batch, feature_dim
NUM_HEADS = 4
HEAD_DIM = F // NUM_HEADS
HIDDEN = 32                  # dim_feedforward
NUM_LAYERS = 2
EPS = 1e-5                   # nn.LayerNorm default
SCALE = 1.0 / math.sqrt(HEAD_DIM)

# packed matrix-blob row offsets (per layer): [in_proj_w; out_proj_w; ffn_w1; ffn_w2]
_IPW0, _OPW0, _W10, _W20 = 0, 3 * F, 4 * F, 4 * F + HIDDEN
MAT_ROWS = 4 * F + HIDDEN + F          # 112
MAT_COLS = max(F, HIDDEN)              # 32
VEC_COLS = 128                         # one (8,128) tile of bias/norm vectors per layer


def _layer_norm(x, w, b):
    mu = jnp.mean(x, axis=-1, keepdims=True)
    var = jnp.mean((x - mu) * (x - mu), axis=-1, keepdims=True)
    return (x - mu) * jax.lax.rsqrt(var + EPS) * w + b


def _heads(qkv3, off):
    # qkv3: (N, T, 3F); take head slices at column offset `off` -> (N*H, T, D),
    # batch index b = h*N + n.
    return jnp.concatenate(
        [qkv3[:, :, off + h * HEAD_DIM: off + (h + 1) * HEAD_DIM]
         for h in range(NUM_HEADS)], axis=0)


def _merge_heads(o):
    # (N*H, T, D) -> (N*T, F), column order h*D + d (PyTorch head concat).
    return jnp.concatenate(
        [o[h * N:(h + 1) * N] for h in range(NUM_HEADS)], axis=-1).reshape(N * T, F)


def transformer_kernel(x_ref, mats_ref, vecs_ref, wout_ref, bout_ref, y_ref):
    x = x_ref[...]                                        # (N*T, F) f32, row = n*T + t

    for l in range(NUM_LAYERS):                           # static, fully unrolled
        mats = mats_ref[l]                                # (112, 32)
        vecs = vecs_ref[l]                                # (8, 128)
        ipw = mats[_IPW0:_OPW0, :F]                       # (3F, F)  packed Wq;Wk;Wv
        opw = mats[_OPW0:_W10, :F]                        # (F, F)
        w1 = mats[_W10:_W20, :F]                          # (HIDDEN, F)
        w2 = mats[_W20:MAT_ROWS, :HIDDEN]                 # (F, HIDDEN)
        ipb = vecs[0:1, :3 * F]
        opb = vecs[1:2, :F]
        n1w, n1b = vecs[2:3, :F], vecs[3:4, :F]
        n2w, n2b = vecs[4:5, :F], vecs[5:6, :F]
        b1 = vecs[6:7, :HIDDEN]
        b2 = vecs[7:8, :F]

        # ---- multi-head self-attention (all heads in one batched dot) ----
        qkv = jnp.einsum('mf,gf->mg', x, ipw,
                         preferred_element_type=jnp.float32) + ipb     # (N*T, 3F)
        qkv3 = qkv.reshape(N, T, 3 * F)                   # free reshape (sublane split)
        qh = _heads(qkv3, 0)                              # (N*H, T, D)
        kh = _heads(qkv3, F)
        vh = _heads(qkv3, 2 * F)
        s = jnp.einsum('btd,bsd->bts', qh, kh,
                       preferred_element_type=jnp.float32) * SCALE     # (N*H, T, T)
        s = s - jnp.max(s, axis=-1, keepdims=True)
        p = jnp.exp(s)
        p = p * pl.reciprocal(jnp.sum(p, axis=-1, keepdims=True), approx=True)
        o = jnp.einsum('bts,bsd->btd', p, vh,
                       preferred_element_type=jnp.float32)             # (N*H, T, D)
        attn = jnp.einsum('mf,gf->mg', _merge_heads(o), opw,
                          preferred_element_type=jnp.float32) + opb    # (N*T, F)

        # dropout layers are identity (inference / eval semantics)
        x = _layer_norm(x + attn, n1w, n1b)

        # ---- feed-forward ----
        h1 = jnp.maximum(
            jnp.einsum('mf,hf->mh', x, w1, preferred_element_type=jnp.float32) + b1,
            0.0)
        ff = jnp.einsum('mh,fh->mf', h1, w2, preferred_element_type=jnp.float32) + b2
        x = _layer_norm(x + ff, n2w, n2b)

    # ---- final output Linear ----
    y_ref[...] = (jnp.einsum('mf,gf->mg', x, wout_ref[...],
                             preferred_element_type=jnp.float32)
                  + bout_ref[...]).astype(y_ref.dtype)


def pack_layer_params(p):
    def pad_last(a, width):
        return jnp.pad(a, ((0, 0), (0, 0), (0, width - a.shape[-1])))

    mats = jnp.concatenate(
        [pad_last(p['in_proj_w'], MAT_COLS),
         pad_last(p['out_proj_w'], MAT_COLS),
         pad_last(p['ffn_w1'], MAT_COLS),
         pad_last(p['ffn_w2'], MAT_COLS)], axis=1)        # (L, 112, 32)
    vecs = jnp.concatenate(
        [pad_last(p['in_proj_b'], VEC_COLS),
         pad_last(p['out_proj_b'], VEC_COLS),
         pad_last(p['norm1_w'], VEC_COLS),
         pad_last(p['norm1_b'], VEC_COLS),
         pad_last(p['norm2_w'], VEC_COLS),
         pad_last(p['norm2_b'], VEC_COLS),
         pad_last(p['ffn_b1'], VEC_COLS),
         pad_last(p['ffn_b2'], VEC_COLS)], axis=1)        # (L, 8, 128)
    return mats, vecs


@jax.jit
def transformer_forecaster(input_seq, params):
    mats, vecs = pack_layer_params(params)
    # batch-major flat activations: row = n*T + t  (attention needs per-batch rows
    # contiguous; the wrapper-side transpose/reshape is free XLA layout work).
    x2d = jnp.transpose(input_seq, (1, 0, 2)).reshape(N * T, F).astype(jnp.float32)
    y2d = pl.pallas_call(
        transformer_kernel,
        out_shape=jax.ShapeDtypeStruct((N * T, F), jnp.float32),
    )(x2d, mats, vecs, params['out_w'], params['out_b'])
    return jnp.transpose(y2d.reshape(N, T, F), (1, 0, 2))


def init_params(key):
    ks = iter(jax.random.split(key, 10))

    def u(k, shape, fan_in):
        s = 1.0 / math.sqrt(fan_in)
        return jax.random.uniform(k, shape, jnp.float32, -s, s)

    L = NUM_LAYERS
    return dict(
        in_proj_w=u(next(ks), (L, 3 * F, F), F),
        in_proj_b=u(next(ks), (L, 1, 3 * F), F),
        out_proj_w=u(next(ks), (L, F, F), F),
        out_proj_b=jnp.zeros((L, 1, F), jnp.float32),
        norm1_w=jnp.ones((L, 1, F), jnp.float32),
        norm1_b=jnp.zeros((L, 1, F), jnp.float32),
        norm2_w=jnp.ones((L, 1, F), jnp.float32),
        norm2_b=jnp.zeros((L, 1, F), jnp.float32),
        ffn_w1=u(next(ks), (L, HIDDEN, F), F),
        ffn_b1=u(next(ks), (L, 1, HIDDEN), F),
        ffn_w2=u(next(ks), (L, F, HIDDEN), HIDDEN),
        ffn_b2=u(next(ks), (L, 1, F), HIDDEN),
        out_w=u(next(ks), (F, F), F),
        out_b=u(next(ks), (1, F), F),
    )


def forward_ref(x, p):
    """Pure-JAX reference mirroring PyTorch TransformerEncoder(eval) + Linear."""
    x = x.astype(jnp.float32)
    for l in range(NUM_LAYERS):
        ipw, ipb = p['in_proj_w'][l], p['in_proj_b'][l]
        opw, opb = p['out_proj_w'][l], p['out_proj_b'][l]
        q = x @ ipw[:F].T + ipb[:, :F]
        k = x @ ipw[F:2 * F].T + ipb[:, F:2 * F]
        v = x @ ipw[2 * F:].T + ipb[:, 2 * F:]
        qh = q.reshape(T, N, NUM_HEADS, HEAD_DIM)
        kh = k.reshape(T, N, NUM_HEADS, HEAD_DIM)
        vh = v.reshape(T, N, NUM_HEADS, HEAD_DIM)
        s = jnp.einsum('tnhd,snhd->nhts', qh, kh) * SCALE
        pr = jax.nn.softmax(s, axis=-1)
        o = jnp.einsum('nhts,snhd->tnhd', pr, vh).reshape(T, N, F)
        attn = o @ opw.T + opb
        x = _layer_norm(x + attn, p['norm1_w'][l], p['norm1_b'][l])
        h1 = jax.nn.relu(x @ p['ffn_w1'][l].T + p['ffn_b1'][l])
        ff = h1 @ p['ffn_w2'][l].T + p['ffn_b2'][l]
        x = _layer_norm(x + ff, p['norm2_w'][l], p['norm2_b'][l])
    return x @ p['out_w'].T + p['out_b']


if __name__ == "__main__":
    key = jax.random.PRNGKey(0)
    k_x, k_p = jax.random.split(key)
    input_seq = jax.random.normal(k_x, (T, N, F), jnp.float32)
    params = init_params(k_p)

    y = transformer_forecaster(input_seq, params)
    jax.block_until_ready(y)

    y_ref = forward_ref(input_seq, params)
    assert y.shape == (T, N, F)
    err = float(jnp.max(jnp.abs(y - y_ref)))
    # tolerance leaves headroom for the approximate (EUP) softmax reciprocal
    assert jnp.allclose(y, y_ref, atol=2e-3, rtol=2e-3), f"max abs err {err}"
    print("KERNEL_OK")
</pallas_src>

<mosaic_0001>
module attributes {stable_mosaic.version = 11 : i64} {
  func.func @transformer_kernel(%arg0: memref<16x16xf32, #tpu.memory_space<vmem>>, %arg1: memref<2x112x32xf32, #tpu.memory_space<vmem>>, %arg2: memref<2x8x128xf32, #tpu.memory_space<vmem>>, %arg3: memref<16x16xf32, #tpu.memory_space<vmem>>, %arg4: memref<1x16xf32, #tpu.memory_space<vmem>>, %arg5: memref<16x16xf32, #tpu.memory_space<vmem>>) attributes {dimension_semantics = [], scalar_prefetch = 0 : i64, scratch_operands = 0 : i64, tpu.core_type = #tpu.core_type<tc>} {
    %c0 = arith.constant 0 : index
    %c0_0 = arith.constant 0 : index
    %0 = vector.load %arg0[%c0, %c0_0] : memref<16x16xf32, #tpu.memory_space<vmem>>, vector<16x16xf32>
    %c0_1 = arith.constant 0 : index
    %c0_2 = arith.constant 0 : index
    %c0_3 = arith.constant 0 : index
    %1 = vector.load %arg1[%c0_1, %c0_2, %c0_3] : memref<2x112x32xf32, #tpu.memory_space<vmem>>, vector<1x112x32xf32>
    %2 = vector.shape_cast %1 : vector<1x112x32xf32> to vector<112x32xf32>
    %c0_4 = arith.constant 0 : index
    %c0_5 = arith.constant 0 : index
    %c0_6 = arith.constant 0 : index
    %3 = vector.load %arg2[%c0_4, %c0_5, %c0_6] : memref<2x8x128xf32, #tpu.memory_space<vmem>>, vector<1x8x128xf32>
    %4 = vector.shape_cast %3 : vector<1x8x128xf32> to vector<8x128xf32>
    %5 = vector.extract_strided_slice %2 {offsets = [0, 0], sizes = [48, 16], strides = [1, 1]} : vector<112x32xf32> to vector<48x16xf32>
    %6 = vector.extract_strided_slice %2 {offsets = [48, 0], sizes = [16, 16], strides = [1, 1]} : vector<112x32xf32> to vector<16x16xf32>
    %7 = vector.extract_strided_slice %2 {offsets = [64, 0], sizes = [32, 16], strides = [1, 1]} : vector<112x32xf32> to vector<32x16xf32>
    %8 = vector.extract_strided_slice %2 {offsets = [96, 0], sizes = [16, 32], strides = [1, 1]} : vector<112x32xf32> to vector<16x32xf32>
    %9 = vector.extract_strided_slice %4 {offsets = [0, 0], sizes = [1, 48], strides = [1, 1]} : vector<8x128xf32> to vector<1x48xf32>
    %10 = vector.extract_strided_slice %4 {offsets = [1, 0], sizes = [1, 16], strides = [1, 1]} : vector<8x128xf32> to vector<1x16xf32>
    %11 = vector.extract_strided_slice %4 {offsets = [2, 0], sizes = [1, 16], strides = [1, 1]} : vector<8x128xf32> to vector<1x16xf32>
    %12 = vector.extract_strided_slice %4 {offsets = [3, 0], sizes = [1, 16], strides = [1, 1]} : vector<8x128xf32> to vector<1x16xf32>
    %13 = vector.extract_strided_slice %4 {offsets = [4, 0], sizes = [1, 16], strides = [1, 1]} : vector<8x128xf32> to vector<1x16xf32>
    %14 = vector.extract_strided_slice %4 {offsets = [5, 0], sizes = [1, 16], strides = [1, 1]} : vector<8x128xf32> to vector<1x16xf32>
    %15 = vector.extract_strided_slice %4 {offsets = [6, 0], sizes = [1, 32], strides = [1, 1]} : vector<8x128xf32> to vector<1x32xf32>
    %16 = vector.extract_strided_slice %4 {offsets = [7, 0], sizes = [1, 16], strides = [1, 1]} : vector<8x128xf32> to vector<1x16xf32>
    "tpu.trace_start"() <{level = 10 : i32, message = "mf,gf->mg"}> : () -> ()
    %cst = arith.constant dense<0.000000e+00> : vector<16x48xf32>
    %17 = tpu.matmul %0, %5, %cst {dimension_numbers = #tpu.dot_dimension_numbers<[1], [1], [0], [0], [0, 0, 1, 0], [], []>} : vector<16x16xf32>, vector<48x16xf32>, vector<16x48xf32> -> vector<16x48xf32>
    "tpu.trace_stop"() : () -> ()
    %18 = vector.broadcast %9 : vector<1x48xf32> to vector<16x48xf32>
    %19 = arith.addf %17, %18 : vector<16x48xf32>
    %20 = vector.shape_cast %19 : vector<16x48xf32> to vector<2x8x48xf32>
    %21 = vector.extract_strided_slice %20 {offsets = [0, 0, 0], sizes = [2, 8, 4], strides = [1, 1, 1]} : vector<2x8x48xf32> to vector<2x8x4xf32>
    %22 = vector.extract_strided_slice %20 {offsets = [0, 0, 4], sizes = [2, 8, 4], strides = [1, 1, 1]} : vector<2x8x48xf32> to vector<2x8x4xf32>
    %23 = vector.extract_strided_slice %20 {offsets = [0, 0, 8], sizes = [2, 8, 4], strides = [1, 1, 1]} : vector<2x8x48xf32> to vector<2x8x4xf32>
    %24 = vector.extract_strided_slice %20 {offsets = [0, 0, 12], sizes = [2, 8, 4], strides = [1, 1, 1]} : vector<2x8x48xf32> to vector<2x8x4xf32>
    %25 = tpu.concatenate %21, %22, %23, %24 in 0 : vector<2x8x4xf32>, vector<2x8x4xf32>, vector<2x8x4xf32>, vector<2x8x4xf32> -> vector<8x8x4xf32>
    %26 = vector.extract_strided_slice %20 {offsets = [0, 0, 16], sizes = [2, 8, 4], strides = [1, 1, 1]} : vector<2x8x48xf32> to vector<2x8x4xf32>
    %27 = vector.extract_strided_slice %20 {offsets = [0, 0, 20], sizes = [2, 8, 4], strides = [1, 1, 1]} : vector<2x8x48xf32> to vector<2x8x4xf32>
    %28 = vector.extract_strided_slice %20 {offsets = [0, 0, 24], sizes = [2, 8, 4], strides = [1, 1, 1]} : vector<2x8x48xf32> to vector<2x8x4xf32>
    %29 = vector.extract_strided_slice %20 {offsets = [0, 0, 28], sizes = [2, 8, 4], strides = [1, 1, 1]} : vector<2x8x48xf32> to vector<2x8x4xf32>
    %30 = tpu.concatenate %26, %27, %28, %29 in 0 : vector<2x8x4xf32>, vector<2x8x4xf32>, vector<2x8x4xf32>, vector<2x8x4xf32> -> vector<8x8x4xf32>
    %31 = vector.extract_strided_slice %20 {offsets = [0, 0, 32], sizes = [2, 8, 4], strides = [1, 1, 1]} : vector<2x8x48xf32> to vector<2x8x4xf32>
    %32 = vector.extract_strided_slice %20 {offsets = [0, 0, 36], sizes = [2, 8, 4], strides = [1, 1, 1]} : vector<2x8x48xf32> to vector<2x8x4xf32>
    %33 = vector.extract_strided_slice %20 {offsets = [0, 0, 40], sizes = [2, 8, 4], strides = [1, 1, 1]} : vector<2x8x48xf32> to vector<2x8x4xf32>
    %34 = vector.extract_strided_slice %20 {offsets = [0, 0, 44], sizes = [2, 8, 4], strides = [1, 1, 1]} : vector<2x8x48xf32> to vector<2x8x4xf32>
    %35 = tpu.concatenate %31, %32, %33, %34 in 0 : vector<2x8x4xf32>, vector<2x8x4xf32>, vector<2x8x4xf32>, vector<2x8x4xf32> -> vector<8x8x4xf32>
    "tpu.trace_start"() <{level = 10 : i32, message = "btd,bsd->bts"}> : () -> ()
    %cst_7 = arith.constant dense<0.000000e+00> : vector<8x8x8xf32>
    %36 = tpu.matmul %25, %30, %cst_7 {dimension_numbers = #tpu.dot_dimension_numbers<[2], [2], [1], [1], [0, 0, 0, 1, 1, 1], [0], [0]>} : vector<8x8x4xf32>, vector<8x8x4xf32>, vector<8x8x8xf32> -> vector<8x8x8xf32>
    "tpu.trace_stop"() : () -> ()
    %cst_8 = arith.constant 5.000000e-01 : f32
    %37 = vector.broadcast %cst_8 : f32 to vector<8x8x8xf32>
    %38 = arith.mulf %36, %37 : vector<8x8x8xf32>
    %cst_9 = arith.constant dense<0xFF800000> : vector<8x8xf32>
    %39 = vector.multi_reduction <maximumf>, %38, %cst_9 [2] : vector<8x8x8xf32> to vector<8x8xf32>
    %40 = vector.shape_cast %39 : vector<8x8xf32> to vector<8x8x1xf32>
    %41 = vector.broadcast %40 : vector<8x8x1xf32> to vector<8x8x8xf32>
    %42 = arith.subf %38, %41 : vector<8x8x8xf32>
    %43 = math.exp %42 : vector<8x8x8xf32>
    %cst_10 = arith.constant dense<0.000000e+00> : vector<8x8xf32>
    %44 = vector.multi_reduction <add>, %43, %cst_10 [2] : vector<8x8x8xf32> to vector<8x8xf32>
    %45 = vector.shape_cast %44 : vector<8x8xf32> to vector<8x8x1xf32>
    %46 = tpu.reciprocal %45 {approx = true} : vector<8x8x1xf32> -> vector<8x8x1xf32>
    %47 = vector.broadcast %46 : vector<8x8x1xf32> to vector<8x8x8xf32>
    %48 = arith.mulf %43, %47 : vector<8x8x8xf32>
    "tpu.trace_start"() <{level = 10 : i32, message = "bts,bsd->btd"}> : () -> ()
    %cst_11 = arith.constant dense<0.000000e+00> : vector<8x8x4xf32>
    %49 = tpu.matmul %48, %35, %cst_11 {dimension_numbers = #tpu.dot_dimension_numbers<[2], [1], [1], [2], [0, 0, 0, 1, 1, 2], [0], [0]>} : vector<8x8x8xf32>, vector<8x8x4xf32>, vector<8x8x4xf32> -> vector<8x8x4xf32>
    "tpu.trace_stop"() : () -> ()
    %50 = vector.extract_strided_slice %49 {offsets = [0, 0, 0], sizes = [2, 8, 4], strides = [1, 1, 1]} : vector<8x8x4xf32> to vector<2x8x4xf32>
    %51 = vector.extract_strided_slice %49 {offsets = [2, 0, 0], sizes = [2, 8, 4], strides = [1, 1, 1]} : vector<8x8x4xf32> to vector<2x8x4xf32>
    %52 = vector.extract_strided_slice %49 {offsets = [4, 0, 0], sizes = [2, 8, 4], strides = [1, 1, 1]} : vector<8x8x4xf32> to vector<2x8x4xf32>
    %53 = vector.extract_strided_slice %49 {offsets = [6, 0, 0], sizes = [2, 8, 4], strides = [1, 1, 1]} : vector<8x8x4xf32> to vector<2x8x4xf32>
    %54 = tpu.concatenate %50, %51, %52, %53 in 2 : vector<2x8x4xf32>, vector<2x8x4xf32>, vector<2x8x4xf32>, vector<2x8x4xf32> -> vector<2x8x16xf32>
    %55 = vector.shape_cast %54 : vector<2x8x16xf32> to vector<16x16xf32>
    "tpu.trace_start"() <{level = 10 : i32, message = "mf,gf->mg"}> : () -> ()
    %cst_12 = arith.constant dense<0.000000e+00> : vector<16x16xf32>
    %56 = tpu.matmul %55, %6, %cst_12 {dimension_numbers = #tpu.dot_dimension_numbers<[1], [1], [0], [0], [0, 0, 1, 0], [], []>} : vector<16x16xf32>, vector<16x16xf32>, vector<16x16xf32> -> vector<16x16xf32>
    "tpu.trace_stop"() : () -> ()
    %57 = vector.broadcast %10 : vector<1x16xf32> to vector<16x16xf32>
    %58 = arith.addf %56, %57 : vector<16x16xf32>
    %59 = arith.addf %0, %58 : vector<16x16xf32>
    %cst_13 = arith.constant dense<0.000000e+00> : vector<16xf32>
    %60 = vector.multi_reduction <add>, %59, %cst_13 [1] : vector<16x16xf32> to vector<16xf32>
    %61 = vector.shape_cast %60 : vector<16xf32> to vector<16x1xf32>
    %cst_14 = arith.constant 1.600000e+01 : f32
    %62 = vector.broadcast %cst_14 : f32 to vector<16x1xf32>
    %63 = arith.divf %61, %62 : vector<16x1xf32>
    %64 = vector.broadcast %63 : vector<16x1xf32> to vector<16x16xf32>
    %65 = arith.subf %59, %64 : vector<16x16xf32>
    %66 = vector.broadcast %63 : vector<16x1xf32> to vector<16x16xf32>
    %67 = arith.subf %59, %66 : vector<16x16xf32>
    %68 = arith.mulf %65, %67 : vector<16x16xf32>
    %cst_15 = arith.constant dense<0.000000e+00> : vector<16xf32>
    %69 = vector.multi_reduction <add>, %68, %cst_15 [1] : vector<16x16xf32> to vector<16xf32>
    %70 = vector.shape_cast %69 : vector<16xf32> to vector<16x1xf32>
    %cst_16 = arith.constant 1.600000e+01 : f32
    %71 = vector.broadcast %cst_16 : f32 to vector<16x1xf32>
    %72 = arith.divf %70, %71 : vector<16x1xf32>
    %73 = vector.broadcast %63 : vector<16x1xf32> to vector<16x16xf32>
    %74 = arith.subf %59, %73 : vector<16x16xf32>
    %cst_17 = arith.constant 9.99999974E-6 : f32
    %75 = vector.broadcast %cst_17 : f32 to vector<16x1xf32>
    %76 = arith.addf %72, %75 : vector<16x1xf32>
    %77 = math.rsqrt %76 : vector<16x1xf32>
    %78 = vector.broadcast %77 : vector<16x1xf32> to vector<16x16xf32>
    %79 = arith.mulf %74, %78 : vector<16x16xf32>
    %80 = vector.broadcast %11 : vector<1x16xf32> to vector<16x16xf32>
    %81 = arith.mulf %79, %80 : vector<16x16xf32>
    %82 = vector.broadcast %12 : vector<1x16xf32> to vector<16x16xf32>
    %83 = arith.addf %81, %82 : vector<16x16xf32>
    "tpu.trace_start"() <{level = 10 : i32, message = "mf,hf->mh"}> : () -> ()
    %cst_18 = arith.constant dense<0.000000e+00> : vector<16x32xf32>
    %84 = tpu.matmul %83, %7, %cst_18 {dimension_numbers = #tpu.dot_dimension_numbers<[1], [1], [0], [0], [0, 0, 1, 0], [], []>} : vector<16x16xf32>, vector<32x16xf32>, vector<16x32xf32> -> vector<16x32xf32>
    "tpu.trace_stop"() : () -> ()
    %85 = vector.broadcast %15 : vector<1x32xf32> to vector<16x32xf32>
    %86 = arith.addf %84, %85 : vector<16x32xf32>
    %cst_19 = arith.constant 0.000000e+00 : f32
    %87 = vector.broadcast %cst_19 : f32 to vector<16x32xf32>
    %88 = arith.maximumf %86, %87 : vector<16x32xf32>
    "tpu.trace_start"() <{level = 10 : i32, message = "mh,fh->mf"}> : () -> ()
    %cst_20 = arith.constant dense<0.000000e+00> : vector<16x16xf32>
    %89 = tpu.matmul %88, %8, %cst_20 {dimension_numbers = #tpu.dot_dimension_numbers<[1], [1], [0], [0], [0, 0, 1, 0], [], []>} : vector<16x32xf32>, vector<16x32xf32>, vector<16x16xf32> -> vector<16x16xf32>
    "tpu.trace_stop"() : () -> ()
    %90 = vector.broadcast %16 : vector<1x16xf32> to vector<16x16xf32>
    %91 = arith.addf %89, %90 : vector<16x16xf32>
    %92 = arith.addf %83, %91 : vector<16x16xf32>
    %cst_21 = arith.constant dense<0.000000e+00> : vector<16xf32>
    %93 = vector.multi_reduction <add>, %92, %cst_21 [1] : vector<16x16xf32> to vector<16xf32>
    %94 = vector.shape_cast %93 : vector<16xf32> to vector<16x1xf32>
    %cst_22 = arith.constant 1.600000e+01 : f32
    %95 = vector.broadcast %cst_22 : f32 to vector<16x1xf32>
    %96 = arith.divf %94, %95 : vector<16x1xf32>
    %97 = vector.broadcast %96 : vector<16x1xf32> to vector<16x16xf32>
    %98 = arith.subf %92, %97 : vector<16x16xf32>
    %99 = vector.broadcast %96 : vector<16x1xf32> to vector<16x16xf32>
    %100 = arith.subf %92, %99 : vector<16x16xf32>
    %101 = arith.mulf %98, %100 : vector<16x16xf32>
    %cst_23 = arith.constant dense<0.000000e+00> : vector<16xf32>
    %102 = vector.multi_reduction <add>, %101, %cst_23 [1] : vector<16x16xf32> to vector<16xf32>
    %103 = vector.shape_cast %102 : vector<16xf32> to vector<16x1xf32>
    %cst_24 = arith.constant 1.600000e+01 : f32
    %104 = vector.broadcast %cst_24 : f32 to vector<16x1xf32>
    %105 = arith.divf %103, %104 : vector<16x1xf32>
    %106 = vector.broadcast %96 : vector<16x1xf32> to vector<16x16xf32>
    %107 = arith.subf %92, %106 : vector<16x16xf32>
    %cst_25 = arith.constant 9.99999974E-6 : f32
    %108 = vector.broadcast %cst_25 : f32 to vector<16x1xf32>
    %109 = arith.addf %105, %108 : vector<16x1xf32>
    %110 = math.rsqrt %109 : vector<16x1xf32>
    %111 = vector.broadcast %110 : vector<16x1xf32> to vector<16x16xf32>
    %112 = arith.mulf %107, %111 : vector<16x16xf32>
    %113 = vector.broadcast %13 : vector<1x16xf32> to vector<16x16xf32>
    %114 = arith.mulf %112, %113 : vector<16x16xf32>
    %115 = vector.broadcast %14 : vector<1x16xf32> to vector<16x16xf32>
    %116 = arith.addf %114, %115 : vector<16x16xf32>
    %c1 = arith.constant 1 : index
    %c0_26 = arith.constant 0 : index
    %c0_27 = arith.constant 0 : index
    %117 = vector.load %arg1[%c1, %c0_26, %c0_27] : memref<2x112x32xf32, #tpu.memory_space<vmem>>, vector<1x112x32xf32>
    %118 = vector.shape_cast %117 : vector<1x112x32xf32> to vector<112x32xf32>
    %c1_28 = arith.constant 1 : index
    %c0_29 = arith.constant 0 : index
    %c0_30 = arith.constant 0 : index
    %119 = vector.load %arg2[%c1_28, %c0_29, %c0_30] : memref<2x8x128xf32, #tpu.memory_space<vmem>>, vector<1x8x128xf32>
    %120 = vector.shape_cast %119 : vector<1x8x128xf32> to vector<8x128xf32>
    %121 = vector.extract_strided_slice %118 {offsets = [0, 0], sizes = [48, 16], strides = [1, 1]} : vector<112x32xf32> to vector<48x16xf32>
    %122 = vector.extract_strided_slice %118 {offsets = [48, 0], sizes = [16, 16], strides = [1, 1]} : vector<112x32xf32> to vector<16x16xf32>
    %123 = vector.extract_strided_slice %118 {offsets = [64, 0], sizes = [32, 16], strides = [1, 1]} : vector<112x32xf32> to vector<32x16xf32>
    %124 = vector.extract_strided_slice %118 {offsets = [96, 0], sizes = [16, 32], strides = [1, 1]} : vector<112x32xf32> to vector<16x32xf32>
    %125 = vector.extract_strided_slice %120 {offsets = [0, 0], sizes = [1, 48], strides = [1, 1]} : vector<8x128xf32> to vector<1x48xf32>
    %126 = vector.extract_strided_slice %120 {offsets = [1, 0], sizes = [1, 16], strides = [1, 1]} : vector<8x128xf32> to vector<1x16xf32>
    %127 = vector.extract_strided_slice %120 {offsets = [2, 0], sizes = [1, 16], strides = [1, 1]} : vector<8x128xf32> to vector<1x16xf32>
    %128 = vector.extract_strided_slice %120 {offsets = [3, 0], sizes = [1, 16], strides = [1, 1]} : vector<8x128xf32> to vector<1x16xf32>
    %129 = vector.extract_strided_slice %120 {offsets = [4, 0], sizes = [1, 16], strides = [1, 1]} : vector<8x128xf32> to vector<1x16xf32>
    %130 = vector.extract_strided_slice %120 {offsets = [5, 0], sizes = [1, 16], strides = [1, 1]} : vector<8x128xf32> to vector<1x16xf32>
    %131 = vector.extract_strided_slice %120 {offsets = [6, 0], sizes = [1, 32], strides = [1, 1]} : vector<8x128xf32> to vector<1x32xf32>
    %132 = vector.extract_strided_slice %120 {offsets = [7, 0], sizes = [1, 16], strides = [1, 1]} : vector<8x128xf32> to vector<1x16xf32>
    "tpu.trace_start"() <{level = 10 : i32, message = "mf,gf->mg"}> : () -> ()
    %cst_31 = arith.constant dense<0.000000e+00> : vector<16x48xf32>
    %133 = tpu.matmul %116, %121, %cst_31 {dimension_numbers = #tpu.dot_dimension_numbers<[1], [1], [0], [0], [0, 0, 1, 0], [], []>} : vector<16x16xf32>, vector<48x16xf32>, vector<16x48xf32> -> vector<16x48xf32>
    "tpu.trace_stop"() : () -> ()
    %134 = vector.broadcast %125 : vector<1x48xf32> to vector<16x48xf32>
    %135 = arith.addf %133, %134 : vector<16x48xf32>
    %136 = vector.shape_cast %135 : vector<16x48xf32> to vector<2x8x48xf32>
    %137 = vector.extract_strided_slice %136 {offsets = [0, 0, 0], sizes = [2, 8, 4], strides = [1, 1, 1]} : vector<2x8x48xf32> to vector<2x8x4xf32>
    %138 = vector.extract_strided_slice %136 {offsets = [0, 0, 4], sizes = [2, 8, 4], strides = [1, 1, 1]} : vector<2x8x48xf32> to vector<2x8x4xf32>
    %139 = vector.extract_strided_slice %136 {offsets = [0, 0, 8], sizes = [2, 8, 4], strides = [1, 1, 1]} : vector<2x8x48xf32> to vector<2x8x4xf32>
    %140 = vector.extract_strided_slice %136 {offsets = [0, 0, 12], sizes = [2, 8, 4], strides = [1, 1, 1]} : vector<2x8x48xf32> to vector<2x8x4xf32>
    %141 = tpu.concatenate %137, %138, %139, %140 in 0 : vector<2x8x4xf32>, vector<2x8x4xf32>, vector<2x8x4xf32>, vector<2x8x4xf32> -> vector<8x8x4xf32>
    %142 = vector.extract_strided_slice %136 {offsets = [0, 0, 16], sizes = [2, 8, 4], strides = [1, 1, 1]} : vector<2x8x48xf32> to vector<2x8x4xf32>
    %143 = vector.extract_strided_slice %136 {offsets = [0, 0, 20], sizes = [2, 8, 4], strides = [1, 1, 1]} : vector<2x8x48xf32> to vector<2x8x4xf32>
    %144 = vector.extract_strided_slice %136 {offsets = [0, 0, 24], sizes = [2, 8, 4], strides = [1, 1, 1]} : vector<2x8x48xf32> to vector<2x8x4xf32>
    %145 = vector.extract_strided_slice %136 {offsets = [0, 0, 28], sizes = [2, 8, 4], strides = [1, 1, 1]} : vector<2x8x48xf32> to vector<2x8x4xf32>
    %146 = tpu.concatenate %142, %143, %144, %145 in 0 : vector<2x8x4xf32>, vector<2x8x4xf32>, vector<2x8x4xf32>, vector<2x8x4xf32> -> vector<8x8x4xf32>
    %147 = vector.extract_strided_slice %136 {offsets = [0, 0, 32], sizes = [2, 8, 4], strides = [1, 1, 1]} : vector<2x8x48xf32> to vector<2x8x4xf32>
    %148 = vector.extract_strided_slice %136 {offsets = [0, 0, 36], sizes = [2, 8, 4], strides = [1, 1, 1]} : vector<2x8x48xf32> to vector<2x8x4xf32>
    %149 = vector.extract_strided_slice %136 {offsets = [0, 0, 40], sizes = [2, 8, 4], strides = [1, 1, 1]} : vector<2x8x48xf32> to vector<2x8x4xf32>
    %150 = vector.extract_strided_slice %136 {offsets = [0, 0, 44], sizes = [2, 8, 4], strides = [1, 1, 1]} : vector<2x8x48xf32> to vector<2x8x4xf32>
    %151 = tpu.concatenate %147, %148, %149, %150 in 0 : vector<2x8x4xf32>, vector<2x8x4xf32>, vector<2x8x4xf32>, vector<2x8x4xf32> -> vector<8x8x4xf32>
    "tpu.trace_start"() <{level = 10 : i32, message = "btd,bsd->bts"}> : () -> ()
    %cst_32 = arith.constant dense<0.000000e+00> : vector<8x8x8xf32>
    %152 = tpu.matmul %141, %146, %cst_32 {dimension_numbers = #tpu.dot_dimension_numbers<[2], [2], [1], [1], [0, 0, 0, 1, 1, 1], [0], [0]>} : vector<8x8x4xf32>, vector<8x8x4xf32>, vector<8x8x8xf32> -> vector<8x8x8xf32>
    "tpu.trace_stop"() : () -> ()
    %cst_33 = arith.constant 5.000000e-01 : f32
    %153 = vector.broadcast %cst_33 : f32 to vector<8x8x8xf32>
    %154 = arith.mulf %152, %153 : vector<8x8x8xf32>
    %cst_34 = arith.constant dense<0xFF800000> : vector<8x8xf32>
    %155 = vector.multi_reduction <maximumf>, %154, %cst_34 [2] : vector<8x8x8xf32> to vector<8x8xf32>
    %156 = vector.shape_cast %155 : vector<8x8xf32> to vector<8x8x1xf32>
    %157 = vector.broadcast %156 : vector<8x8x1xf32> to vector<8x8x8xf32>
    %158 = arith.subf %154, %157 : vector<8x8x8xf32>
    %159 = math.exp %158 : vector<8x8x8xf32>
    %cst_35 = arith.constant dense<0.000000e+00> : vector<8x8xf32>
    %160 = vector.multi_reduction <add>, %159, %cst_35 [2] : vector<8x8x8xf32> to vector<8x8xf32>
    %161 = vector.shape_cast %160 : vector<8x8xf32> to vector<8x8x1xf32>
    %162 = tpu.reciprocal %161 {approx = true} : vector<8x8x1xf32> -> vector<8x8x1xf32>
    %163 = vector.broadcast %162 : vector<8x8x1xf32> to vector<8x8x8xf32>
    %164 = arith.mulf %159, %163 : vector<8x8x8xf32>
    "tpu.trace_start"() <{level = 10 : i32, message = "bts,bsd->btd"}> : () -> ()
    %cst_36 = arith.constant dense<0.000000e+00> : vector<8x8x4xf32>
    %165 = tpu.matmul %164, %151, %cst_36 {dimension_numbers = #tpu.dot_dimension_numbers<[2], [1], [1], [2], [0, 0, 0, 1, 1, 2], [0], [0]>} : vector<8x8x8xf32>, vector<8x8x4xf32>, vector<8x8x4xf32> -> vector<8x8x4xf32>
    "tpu.trace_stop"() : () -> ()
    %166 = vector.extract_strided_slice %165 {offsets = [0, 0, 0], sizes = [2, 8, 4], strides = [1, 1, 1]} : vector<8x8x4xf32> to vector<2x8x4xf32>
    %167 = vector.extract_strided_slice %165 {offsets = [2, 0, 0], sizes = [2, 8, 4], strides = [1, 1, 1]} : vector<8x8x4xf32> to vector<2x8x4xf32>
    %168 = vector.extract_strided_slice %165 {offsets = [4, 0, 0], sizes = [2, 8, 4], strides = [1, 1, 1]} : vector<8x8x4xf32> to vector<2x8x4xf32>
    %169 = vector.extract_strided_slice %165 {offsets = [6, 0, 0], sizes = [2, 8, 4], strides = [1, 1, 1]} : vector<8x8x4xf32> to vector<2x8x4xf32>
    %170 = tpu.concatenate %166, %167, %168, %169 in 2 : vector<2x8x4xf32>, vector<2x8x4xf32>, vector<2x8x4xf32>, vector<2x8x4xf32> -> vector<2x8x16xf32>
    %171 = vector.shape_cast %170 : vector<2x8x16xf32> to vector<16x16xf32>
    "tpu.trace_start"() <{level = 10 : i32, message = "mf,gf->mg"}> : () -> ()
    %cst_37 = arith.constant dense<0.000000e+00> : vector<16x16xf32>
    %172 = tpu.matmul %171, %122, %cst_37 {dimension_numbers = #tpu.dot_dimension_numbers<[1], [1], [0], [0], [0, 0, 1, 0], [], []>} : vector<16x16xf32>, vector<16x16xf32>, vector<16x16xf32> -> vector<16x16xf32>
    "tpu.trace_stop"() : () -> ()
    %173 = vector.broadcast %126 : vector<1x16xf32> to vector<16x16xf32>
    %174 = arith.addf %172, %173 : vector<16x16xf32>
    %175 = arith.addf %116, %174 : vector<16x16xf32>
    %cst_38 = arith.constant dense<0.000000e+00> : vector<16xf32>
    %176 = vector.multi_reduction <add>, %175, %cst_38 [1] : vector<16x16xf32> to vector<16xf32>
    %177 = vector.shape_cast %176 : vector<16xf32> to vector<16x1xf32>
    %cst_39 = arith.constant 1.600000e+01 : f32
    %178 = vector.broadcast %cst_39 : f32 to vector<16x1xf32>
    %179 = arith.divf %177, %178 : vector<16x1xf32>
    %180 = vector.broadcast %179 : vector<16x1xf32> to vector<16x16xf32>
    %181 = arith.subf %175, %180 : vector<16x16xf32>
    %182 = vector.broadcast %179 : vector<16x1xf32> to vector<16x16xf32>
    %183 = arith.subf %175, %182 : vector<16x16xf32>
    %184 = arith.mulf %181, %183 : vector<16x16xf32>
    %cst_40 = arith.constant dense<0.000000e+00> : vector<16xf32>
    %185 = vector.multi_reduction <add>, %184, %cst_40 [1] : vector<16x16xf32> to vector<16xf32>
    %186 = vector.shape_cast %185 : vector<16xf32> to vector<16x1xf32>
    %cst_41 = arith.constant 1.600000e+01 : f32
    %187 = vector.broadcast %cst_41 : f32 to vector<16x1xf32>
    %188 = arith.divf %186, %187 : vector<16x1xf32>
    %189 = vector.broadcast %179 : vector<16x1xf32> to vector<16x16xf32>
    %190 = arith.subf %175, %189 : vector<16x16xf32>
    %cst_42 = arith.constant 9.99999974E-6 : f32
    %191 = vector.broadcast %cst_42 : f32 to vector<16x1xf32>
    %192 = arith.addf %188, %191 : vector<16x1xf32>
    %193 = math.rsqrt %192 : vector<16x1xf32>
    %194 = vector.broadcast %193 : vector<16x1xf32> to vector<16x16xf32>
    %195 = arith.mulf %190, %194 : vector<16x16xf32>
    %196 = vector.broadcast %127 : vector<1x16xf32> to vector<16x16xf32>
    %197 = arith.mulf %195, %196 : vector<16x16xf32>
    %198 = vector.broadcast %128 : vector<1x16xf32> to vector<16x16xf32>
    %199 = arith.addf %197, %198 : vector<16x16xf32>
    "tpu.trace_start"() <{level = 10 : i32, message = "mf,hf->mh"}> : () -> ()
    %cst_43 = arith.constant dense<0.000000e+00> : vector<16x32xf32>
    %200 = tpu.matmul %199, %123, %cst_43 {dimension_numbers = #tpu.dot_dimension_numbers<[1], [1], [0], [0], [0, 0, 1, 0], [], []>} : vector<16x16xf32>, vector<32x16xf32>, vector<16x32xf32> -> vector<16x32xf32>
    "tpu.trace_stop"() : () -> ()
    %201 = vector.broadcast %131 : vector<1x32xf32> to vector<16x32xf32>
    %202 = arith.addf %200, %201 : vector<16x32xf32>
    %cst_44 = arith.constant 0.000000e+00 : f32
    %203 = vector.broadcast %cst_44 : f32 to vector<16x32xf32>
    %204 = arith.maximumf %202, %203 : vector<16x32xf32>
    "tpu.trace_start"() <{level = 10 : i32, message = "mh,fh->mf"}> : () -> ()
    %cst_45 = arith.constant dense<0.000000e+00> : vector<16x16xf32>
    %205 = tpu.matmul %204, %124, %cst_45 {dimension_numbers = #tpu.dot_dimension_numbers<[1], [1], [0], [0], [0, 0, 1, 0], [], []>} : vector<16x32xf32>, vector<16x32xf32>, vector<16x16xf32> -> vector<16x16xf32>
    "tpu.trace_stop"() : () -> ()
    %206 = vector.broadcast %132 : vector<1x16xf32> to vector<16x16xf32>
    %207 = arith.addf %205, %206 : vector<16x16xf32>
    %208 = arith.addf %199, %207 : vector<16x16xf32>
    %cst_46 = arith.constant dense<0.000000e+00> : vector<16xf32>
    %209 = vector.multi_reduction <add>, %208, %cst_46 [1] : vector<16x16xf32> to vector<16xf32>
    %210 = vector.shape_cast %209 : vector<16xf32> to vector<16x1xf32>
    %cst_47 = arith.constant 1.600000e+01 : f32
    %211 = vector.broadcast %cst_47 : f32 to vector<16x1xf32>
    %212 = arith.divf %210, %211 : vector<16x1xf32>
    %213 = vector.broadcast %212 : vector<16x1xf32> to vector<16x16xf32>
    %214 = arith.subf %208, %213 : vector<16x16xf32>
    %215 = vector.broadcast %212 : vector<16x1xf32> to vector<16x16xf32>
    %216 = arith.subf %208, %215 : vector<16x16xf32>
    %217 = arith.mulf %214, %216 : vector<16x16xf32>
    %cst_48 = arith.constant dense<0.000000e+00> : vector<16xf32>
    %218 = vector.multi_reduction <add>, %217, %cst_48 [1] : vector<16x16xf32> to vector<16xf32>
    %219 = vector.shape_cast %218 : vector<16xf32> to vector<16x1xf32>
    %cst_49 = arith.constant 1.600000e+01 : f32
    %220 = vector.broadcast %cst_49 : f32 to vector<16x1xf32>
    %221 = arith.divf %219, %220 : vector<16x1xf32>
    %222 = vector.broadcast %212 : vector<16x1xf32> to vector<16x16xf32>
    %223 = arith.subf %208, %222 : vector<16x16xf32>
    %cst_50 = arith.constant 9.99999974E-6 : f32
    %224 = vector.broadcast %cst_50 : f32 to vector<16x1xf32>
    %225 = arith.addf %221, %224 : vector<16x1xf32>
    %226 = math.rsqrt %225 : vector<16x1xf32>
    %227 = vector.broadcast %226 : vector<16x1xf32> to vector<16x16xf32>
    %228 = arith.mulf %223, %227 : vector<16x16xf32>
    %229 = vector.broadcast %129 : vector<1x16xf32> to vector<16x16xf32>
    %230 = arith.mulf %228, %229 : vector<16x16xf32>
    %231 = vector.broadcast %130 : vector<1x16xf32> to vector<16x16xf32>
    %232 = arith.addf %230, %231 : vector<16x16xf32>
    %c0_51 = arith.constant 0 : index
    %c0_52 = arith.constant 0 : index
    %233 = vector.load %arg3[%c0_51, %c0_52] : memref<16x16xf32, #tpu.memory_space<vmem>>, vector<16x16xf32>
    "tpu.trace_start"() <{level = 10 : i32, message = "mf,gf->mg"}> : () -> ()
    %cst_53 = arith.constant dense<0.000000e+00> : vector<16x16xf32>
    %234 = tpu.matmul %232, %233, %cst_53 {dimension_numbers = #tpu.dot_dimension_numbers<[1], [1], [0], [0], [0, 0, 1, 0], [], []>} : vector<16x16xf32>, vector<16x16xf32>, vector<16x16xf32> -> vector<16x16xf32>
    "tpu.trace_stop"() : () -> ()
    %c0_54 = arith.constant 0 : index
    %c0_55 = arith.constant 0 : index
    %235 = vector.load %arg4[%c0_54, %c0_55] : memref<1x16xf32, #tpu.memory_space<vmem>>, vector<1x16xf32>
    %236 = vector.broadcast %235 : vector<1x16xf32> to vector<16x16xf32>
    %237 = arith.addf %234, %236 : vector<16x16xf32>
    %c0_56 = arith.constant 0 : index
    %c0_57 = arith.constant 0 : index
    %238 = vector.load %arg5[%c0_56, %c0_57] : memref<16x16xf32, #tpu.memory_space<vmem>>, vector<16x16xf32>
    tpu.vector_store %arg5[%c0_56, %c0_57], %237 {strides = array<i32>} : memref<16x16xf32, #tpu.memory_space<vmem>>, vector<16x16xf32>,
    return
  }
}

</mosaic_0001>

<bundles_post_ra>
// kernel: transformer_forecaster.1
= control target key start
LH: loop header
LB: loop body
LE: loop exit
PB: predicated region body
PF: predicated region fallthrough
CT: control target
= control target key end

     0   :  { %vm41_vm0 = vcmask 130048   ;;  %v37_v8 = vlaneseq  ;;  %v4363_v14 = vmov 0.0   ;;  %s4365_s11 = smov 124   ;;  %vm4366_vm1 = vmmov 0   ;;  %s4367_s12 = smov 116   ;;  %s5052_s1 = inlined_call_operand.vmem [shape: f32[2,112,32], index: 1, kind: input, shape index: {}]   ;;  %s5053_s0 = inlined_call_operand.vmem [shape: f32[16,16], index: 0, kind: input, shape index: {}]   ;;  %s5054_s2 = inlined_call_operand.vmem [shape: f32[2,8,128], index: 2, kind: input, shape index: {}]   ;;  %s5055_s3 = inlined_call_operand.vmem [shape: f32[16,16], index: 3, kind: input, shape index: {}]   ;;  %s5056_s4 = inlined_call_operand.vmem [shape: f32[1,16], index: 4, kind: input, shape index: {}]   ;;  %s5057_s5 = inlined_call_operand.vmem [shape: f32[16,16], index: 5, kind: output, shape index: {}]  }
   0x1   :  { %v27_v0 = vld [vmem:[%s5052_s1 + $0x28] sm:$0xff]  ;;  %v26_v1 = vld [vmem:[%s5052_s1 + $0x20] sm:$0xff]  ;;  %v25_v3 = vld [vmem:[%s5052_s1 + $0x18] sm:$0xff]  ;;  %4041 = vmatprep.subr.mxu1 %v4363_v14  ;;  %4043 = vmatprep.mubr.msk.f32.mxu1 %vm4366_vm1, %v4363_v14  ;;  %s4368_s13 = smov 112   ;;  %vm157_vm2 = vcmask 31744   ;;  %vm772_vm3 = vcmask 64512  }
   0x2   :  { %4026 = vmatprep.subr.msk.mxu0 %vm41_vm0, %v27_v0  ;;  %v4414_v2 = vld [vmem:[%s5053_s0] sm:$0xff]  ;;  %v24_v4 = vld [vmem:[%s5052_s1 + $0x10] sm:$0xff]  ;;  %v23_v5 = vld [vmem:[%s5052_s1 + $0x8] sm:$0xff]  ;;  %v4447_v9 = vshrl.u32 %v37_v8, 7  ;;  %s4369_s14 = smov 96   ;;  %s4370_s17 = smov 4  }
   0x3   :  { %4027 = vmatpush3.xpose.msk.msra.mxu0 %vm41_vm0, %v27_v0  ;;  %4038 = vmatprep.mubr.msk.f32.mxu0 %vm41_vm0, %v4414_v2  ;;  %v22_v6 = vld [vmem:[%s5052_s1] sm:$0xff]  ;;  %v4443_v7 = vld [vmem:[%s5053_s0 + $0x8] sm:$0xff]  ;;  %s4364_s0 = smov 120   ;;  %s4371_s20 = smov 8   ;;  %vm1497_vm4 = vcmask 97280   ;;  %vm1735_vm5 = vcmask 261120  }
   0x4   :  { %4028 = vmatprep.subr.msk.mxu0 %vm41_vm0, %v26_v1  ;;  %v39_v10 = vsub.s32 0, %v4447_v9  ;;  %v4453_v11 = vld [vmem:[%s5054_s2] sm:$0xff]  ;;  %s4372_s21 = smov 12  }
   0x6   :  { %v40_v13 = vrot.slane %v4453_v11, %v39_v10 }
   0x7   :  { %4029 = vmatpush3.xpose.msk.msra.mxu0 %vm41_vm0, %v26_v1 }
   0x8   :  { %4030 = vmatprep.subr.msk.mxu0 %vm41_vm0, %v25_v3 }
   0xb   :  { %4031 = vmatpush3.xpose.msk.msra.mxu0 %vm41_vm0, %v25_v3 }
   0xc   :  { %4032 = vmatprep.subr.msk.mxu0 %vm41_vm0, %v24_v4 }
   0xf   :  { %4033 = vmatpush3.xpose.msk.msra.mxu0 %vm41_vm0, %v24_v4 }
  0x10   :  { %4034 = vmatprep.subr.msk.mxu0 %vm41_vm0, %v23_v5 }
  0x13   :  { %4035 = vmatpush3.xpose.msk.msra.mxu0 %vm41_vm0, %v23_v5 }
  0x14   :  { %4036 = vmatprep.subr.msk.mxu0 %vm41_vm0, %v22_v6 }
  0x17   :  { %4037 = vmatpush3.xpose.msk.msra.mxu0 %vm41_vm0, %v22_v6 }
  0x18   :  { %4081 = vmatprep.subr.mxu0 %v4363_v14 }
  0x1a   :  { %4039 = vmatmul.mubr.msk.f32.vlgmr.msra.gmra.mxu0 %vm41_vm0, %v4443_v7 }
  0x1b   :  { %4083 = vmatprep.mubr.msk.f32.mxu0 %vm4366_vm1, %v4363_v14 }
  0xda   :  { %v4040_v12 = vpop.f32.mrf.mxu0 }
  0xdb   :  { %v4470_v17 = vadd.f32 %v4040_v12, %v40_v13 }
  0xdc   :  { %v132_v15 = vpop.f32.mrf.mxu0 }
  0xdd   :  { %v4460_v16 = vadd.f32 %v132_v15, %v40_v13 }
  0xdf   :  { %147 = vrot.lane.b32.xlu1 %v4460_v16, %s4364_s0  ;;  %143 = vrot.lane.b32.xlu0 %v4460_v16, %s4365_s11 }
  0xe3   :  { %149 = vrot.lane.b32.xlu1 %v4470_v17, %s4364_s0  ;;  %145 = vrot.lane.b32.xlu0 %v4470_v17, %s4365_s11 }
  0xe7   :  { %153 = vrot.lane.b32.xlu1 %v4470_v17, %s4367_s12  ;;  %151 = vrot.lane.b32.xlu0 %v4460_v16, %s4367_s12 }
  0xeb   :  { %232 = vrot.lane.b32.xlu1 %v4470_v17, %s4368_s13  ;;  %155 = vrot.lane.b32.xlu0 %v4460_v16, %s4368_s13 }
 0x151   :  { %v4484_v18 = vpop.permute.xlu1 %147  ;;  %v4486_v19 = vpop.permute.xlu0 %143 }
 0x152   :  { %308 = vrot.lane.b32.xlu0 %v4486_v19, %s4368_s13 }
 0x155   :  { %v4490_v20 = vpop.permute.xlu1 %149  ;;  %v4492_v21 = vpop.permute.xlu0 %145 }
 0x156   :  { %460 = vrot.lane.b32.xlu0 %v4484_v18, %s4368_s13  ;;  %384 = vrot.lane.b32.xlu1 %v4492_v21, %s4368_s13 }
 0x159   :  { %v4498_v22 = vpop.permute.xlu0 %151  ;;  %v4504_v23 = vpop.permute.xlu1 %153 }
 0x15a   :  { %536 = vrot.lane.b32.xlu1 %v4490_v20, %s4368_s13  ;;  %612 = vrot.lane.b32.xlu0 %v4498_v22, %s4368_s13 }
 0x15d   :  { %v156_v24 = vpop.permute.xlu0 %155  ;;  %v233_v25 = vpop.permute.xlu1 %232 }
 0x15e   :  { %688 = vrot.lane.b32.xlu1 %v4504_v23, %s4368_s13  ;;  %4042 = vmatpush3.xpose.msk.msra.mxu1 %vm157_vm2, %v156_v24 }
 0x15f   :  { %4046 = vmatprep.subr.mxu1 %v4363_v14 }
 0x161   :  { %4044 = vmatmul.mubr.msk.f32.vlgmr.msra.gmra.mxu1 %vm157_vm2, %v4460_v16 }
 0x162   :  { %4047 = vmatpush3.xpose.msk.msra.mxu1 %vm157_vm2, %v233_v25  ;;  %4048 = vmatprep.mubr.msk.f32.mxu1 %vm4366_vm1, %v4363_v14 }
 0x163   :  { %4051 = vmatprep.subr.mxu1 %v4363_v14 }
 0x165   :  { %4049 = vmatmul.mubr.msk.f32.vlgmr.msra.gmra.mxu1 %vm157_vm2, %v4470_v17 }
 0x166   :  { %4053 = vmatprep.mubr.msk.f32.mxu1 %vm4366_vm1, %v4363_v14 }
 0x1c4   :  { %v309_v26 = vpop.permute.xlu0 %308 }
 0x1c5   :  { %4052 = vmatpush3.xpose.msk.msra.mxu1 %vm157_vm2, %v309_v26 }
 0x1c6   :  { %4056 = vmatprep.subr.mxu1 %v4363_v14 }
 0x1c8   :  { %v385_v27 = vpop.permute.xlu1 %384  ;;  %4054 = vmatmul.mubr.msk.f32.vlgmr.msra.gmra.mxu1 %vm157_vm2, %v4486_v19  ;;  %v461_v28 = vpop.permute.xlu0 %460 }
 0x1c9   :  { %4057 = vmatpush3.xpose.msk.msra.mxu1 %vm157_vm2, %v385_v27  ;;  %4058 = vmatprep.mubr.msk.f32.mxu1 %vm4366_vm1, %v4363_v14 }
 0x1ca   :  { %4061 = vmatprep.subr.mxu1 %v4363_v14 }
 0x1cc   :  { %4059 = vmatmul.mubr.msk.f32.vlgmr.msra.gmra.mxu1 %vm157_vm2, %v4492_v21  ;;  %v537_v29 = vpop.permute.xlu1 %536  ;;  %v613_v30 = vpop.permute.xlu0 %612 }
 0x1cd   :  { %4062 = vmatpush3.xpose.msk.msra.mxu1 %vm157_vm2, %v461_v28  ;;  %4063 = vmatprep.mubr.msk.f32.mxu1 %vm4366_vm1, %v4363_v14 }
 0x1ce   :  { %4066 = vmatprep.subr.mxu1 %v4363_v14 }
 0x1d0   :  { %4064 = vmatmul.mubr.msk.f32.vlgmr.msra.gmra.mxu1 %vm157_vm2, %v4484_v18  ;;  %v689_v31 = vpop.permute.xlu1 %688 }
 0x1d1   :  { %4067 = vmatpush3.xpose.msk.msra.mxu1 %vm157_vm2, %v537_v29  ;;  %4068 = vmatprep.mubr.msk.f32.mxu1 %vm4366_vm1, %v4363_v14 }
 0x1d2   :  { %4071 = vmatprep.subr.mxu1 %v4363_v14 }
 0x1d4   :  { %4069 = vmatmul.mubr.msk.f32.vlgmr.msra.gmra.mxu1 %vm157_vm2, %v4490_v20 }
 0x1d5   :  { %4072 = vmatpush3.xpose.msk.msra.mxu1 %vm157_vm2, %v613_v30  ;;  %4073 = vmatprep.mubr.msk.f32.mxu1 %vm4366_vm1, %v4363_v14 }
 0x1d6   :  { %4076 = vmatprep.subr.mxu1 %v4363_v14 }
 0x1d8   :  { %4074 = vmatmul.mubr.msk.f32.vlgmr.msra.gmra.mxu1 %vm157_vm2, %v4498_v22 }
 0x1d9   :  { %4077 = vmatpush3.xpose.msk.msra.mxu1 %vm157_vm2, %v689_v31  ;;  %4078 = vmatprep.mubr.msk.f32.mxu1 %vm4366_vm1, %v4363_v14 }
 0x1da   :  { %4086 = vmatprep.subr.mxu1 %v4363_v14 }
 0x1dc   :  { %4079 = vmatmul.mubr.msk.f32.vlgmr.msra.gmra.mxu1 %vm157_vm2, %v4504_v23 }
 0x1dd   :  { %4088 = vmatprep.mubr.msk.f32.mxu1 %vm4366_vm1, %v4363_v14 }
 0x221   :  { %v228_v32 = vpop.f32.mrf.mxu1 }
 0x222   :  { %v764_v33 = vmul.f32 0.5, %v228_v32 }
 0x223   :  { %v4045_v34 = vpop.f32.mrf.mxu1 }
 0x224   :  { %v773_v35 = vsel %vm772_vm3, %v764_v33, -inf }
 0x225   :  { %774 = vmax.xlane.f32.xlu0 %v773_v35  ;;  %v304_v36 = vpop.f32.mrf.mxu1 }
 0x226   :  { %v765_v37 = vmul.f32 0.5, %v304_v36 }
 0x227   :  { %v4050_v38 = vpop.f32.mrf.mxu1 }
 0x228   :  { %v776_v39 = vsel %vm772_vm3, %v765_v37, -inf }
 0x229   :  { %777 = vmax.xlane.f32.xlu1 %v776_v39 }
 0x288   :  { %v380_v40 = vpop.f32.mrf.mxu1 }
 0x289   :  { %v766_v41 = vmul.f32 0.5, %v380_v40 }
 0x28a   :  { %v4055_v42 = vpop.f32.mrf.mxu1 }
 0x28b   :  { %v779_v43 = vsel %vm772_vm3, %v766_v41, -inf }
 0x28c   :  { %780 = vmax.xlane.f32.xlu0 %v779_v43  ;;  %v456_v44 = vpop.f32.mrf.mxu1 }
 0x28d   :  { %v767_v45 = vmul.f32 0.5, %v456_v44 }
 0x28e   :  { %v4060_v46 = vpop.f32.mrf.mxu1 }
 0x28f   :  { %v782_v47 = vsel %vm772_vm3, %v767_v45, -inf }
 0x290   :  { %783 = vmax.xlane.f32.xlu0 %v782_v47  ;;  %v532_v48 = vpop.f32.mrf.mxu1 }
 0x291   :  { %v768_v49 = vmul.f32 0.5, %v532_v48 }
 0x292   :  { %v4065_v50 = vpop.f32.mrf.mxu1 }
 0x293   :  { %v785_v51 = vsel %vm772_vm3, %v768_v49, -inf }
 0x294   :  { %786 = vmax.xlane.f32.xlu1 %v785_v51  ;;  %v608_v52 = vpop.f32.mrf.mxu1 }
 0x295   :  { %v769_v53 = vmul.f32 0.5, %v608_v52 }
 0x296   :  { %v4070_v54 = vpop.f32.mrf.mxu1 }
 0x297   :  { %v788_v55 = vsel %vm772_vm3, %v769_v53, -inf }
 0x298   :  { %789 = vmax.xlane.f32.xlu0 %v788_v55  ;;  %v684_v56 = vpop.f32.mrf.mxu1 }
 0x299   :  { %v770_v57 = vmul.f32 0.5, %v684_v56 }
 0x29a   :  { %v4075_v58 = vpop.f32.mrf.mxu1 }
 0x29b   :  { %v791_v59 = vsel %vm772_vm3, %v770_v57, -inf }
 0x29c   :  { %792 = vmax.xlane.f32.xlu1 %v791_v59  ;;  %v760_v60 = vpop.f32.mrf.mxu1 }
 0x29d   :  { %v771_v61 = vmul.f32 0.5, %v760_v60 }
 0x29e   :  { %v4080_v62 = vpop.f32.mrf.mxu1 }
 0x29f   :  { %v794_v63 = vsel %vm772_vm3, %v771_v61, -inf }
 0x2a0   :  { %795 = vmax.xlane.f32.xlu0 %v794_v63 }
 0x2ad   :  { %861 = vrot.lane.b32.xlu1 %v4460_v16, %s4369_s14 }
 0x2ae   :  { %v775_v3 = vpop.xlane.xlu0 %774 }
 0x2af   :  { %v797_v4 = vsub.f32 %v764_v33, %v775_v3 }
 0x2b1   :  { %1013 = vrot.lane.b32.xlu1 %v4486_v19, %s4369_s14  ;;  %v805_v6 = vmul.f32 1.442695, %v797_v4 }
 0x2b2   :  { %v778_v0 = vpop.xlane.xlu1 %777 }
 0x2b3   :  { %v798_v1 = vsub.f32 %v765_v37, %v778_v0 }
 0x2b5   :  { %1089 = vrot.lane.b32.xlu1 %v4492_v21, %s4369_s14  ;;  %v807_v5 = vmul.f32 1.442695, %v798_v1 }
 0x2b6   :  { %937 = vrot.lane.b32.xlu0 %v4470_v17, %s4369_s14 }
 0x2b7   :  { %4283 = vpow2.f32 %v807_v5 }
 0x2b8   :  { %4285 = vpow2.f32 %v805_v6 }
 0x2b9   :  { %1241 = vrot.lane.b32.xlu1 %v4490_v20, %s4369_s14 }
 0x2ba   :  { %1165 = vrot.lane.b32.xlu0 %v4484_v18, %s4369_s14 }
 0x2c4   :  { %v4576_v8 = vpop.eup %4283 }
 0x2c5   :  { %v824_v12 = vsel %vm772_vm3, %v4576_v8, 0.0  ;;  %v4580_v13 = vpop.eup %4285 }
 0x2c6   :  { %v821_v15 = vsel %vm772_vm3, %v4580_v13, 0.0 }
 0x2d9   :  { %825 = vadd.xlane.f32.xlu0 %v824_v12 }
 0x2dd   :  { %822 = vadd.xlane.f32.xlu1 %v821_v15 }
 0x315   :  { %v781_v16 = vpop.xlane.xlu0 %780 }
 0x316   :  { %v799_v17 = vsub.f32 %v766_v41, %v781_v16 }
 0x318   :  { %v809_v18 = vmul.f32 1.442695, %v799_v17 }
 0x319   :  { %v784_v19 = vpop.xlane.xlu0 %783 }
 0x31a   :  { %4287 = vpow2.f32 %v809_v18  ;;  %v800_v20 = vsub.f32 %v767_v45, %v784_v19 }
 0x31c   :  { %v811_v21 = vmul.f32 1.442695, %v800_v20 }
 0x31d   :  { %v787_v24 = vpop.xlane.xlu1 %786 }
 0x31e   :  { %4289 = vpow2.f32 %v811_v21  ;;  %v801_v25 = vsub.f32 %v768_v49, %v787_v24 }
 0x320   :  { %v813_v26 = vmul.f32 1.442695, %v801_v25 }
 0x321   :  { %v790_v27 = vpop.xlane.xlu0 %789 }
 0x322   :  { %4291 = vpow2.f32 %v813_v26  ;;  %v802_v28 = vsub.f32 %v769_v53, %v790_v27  ;;  %v29_v27 = vld [vmem:[%s5052_s1 + $0x38] sm:$0xff] }
 0x324   :  { %v815_v29 = vmul.f32 1.442695, %v802_v28 }
 0x325   :  { %v793_v30 = vpop.xlane.xlu1 %792 }
 0x326   :  { %4293 = vpow2.f32 %v815_v29  ;;  %v803_v31 = vsub.f32 %v770_v57, %v793_v30  ;;  %v28_v30 = vld [vmem:[%s5052_s1 + $0x30] sm:$0xff] }
 0x327   :  { %v4288_v32 = vpop.eup %4287 }
 0x328   :  { %v817_v33 = vmul.f32 1.442695, %v803_v31  ;;  %v827_v34 = vsel %vm772_vm3, %v4288_v32, 0.0 }
 0x329   :  { %v862_v35 = vpop.permute.xlu1 %861  ;;  %828 = vadd.xlane.f32.xlu1 %v827_v34  ;;  %v796_v36 = vpop.xlane.xlu0 %795 }
 0x32a   :  { %4295 = vpow2.f32 %v817_v33  ;;  %v804_v37 = vsub.f32 %v771_v61, %v796_v36  ;;  %4082 = vmatpush3.msra.mxu0 %v862_v35 }
 0x32b   :  { %v4290_v38 = vpop.eup %4289  ;;  %4091 = vmatprep.subr.mxu0 %v4363_v14 }
 0x32c   :  { %v819_v39 = vmul.f32 1.442695, %v804_v37  ;;  %v830_v40 = vsel %vm772_vm3, %v4290_v38, 0.0 }
 0x32d   :  { %831 = vadd.xlane.f32.xlu0 %v830_v40  ;;  %v938_v41 = vpop.permute.xlu0 %937  ;;  %v1014_v50 = vpop.permute.xlu1 %1013 }
 0x32e   :  { %4297 = vpow2.f32 %v819_v39  ;;  %4087 = vmatpush3.msra.mxu1 %v938_v41 }
 0x32f   :  { %v4292_v42 = vpop.eup %4291  ;;  %4096 = vmatprep.subr.mxu1 %v4363_v14 }
 0x330   :  { %v833_v43 = vsel %vm772_vm3, %v4292_v42, 0.0 }
 0x331   :  { %834 = vadd.xlane.f32.xlu1 %v833_v43  ;;  %v1090_v51 = vpop.permute.xlu1 %1089  ;;  %v1166_v52 = vpop.permute.xlu0 %1165 }
 0x333   :  { %v4294_v44 = vpop.eup %4293 }
 0x334   :  { %v836_v45 = vsel %vm772_vm3, %v4294_v44, 0.0 }
 0x335   :  { %837 = vadd.xlane.f32.xlu0 %v836_v45  ;;  %v1242_v53 = vpop.permute.xlu1 %1241 }
 0x337   :  { %v4590_v46 = vpop.eup %4295 }
 0x338   :  { %v839_v47 = vsel %vm772_vm3, %v4590_v46, 0.0 }
 0x339   :  { %840 = vadd.xlane.f32.xlu1 %v839_v47 }
 0x33b   :  { %v4594_v48 = vpop.eup %4297 }
 0x33c   :  { %v842_v49 = vsel %vm772_vm3, %v4594_v48, 0.0 }
 0x33d   :  { %843 = vadd.xlane.f32.xlu0 %v842_v49 }
 0x34a   :  { %1393 = vrot.lane.b32.xlu1 %v4504_v23, %s4369_s14 }
 0x353   :  { %1317 = vrot.lane.b32.xlu0 %v4498_v22, %s4369_s14 }
 0x362   :  { %v826_v54 = vpop.xlane.xlu0 %825 }
 0x363   :  { %4299 = vrcp.f32 %v826_v54 }
 0x366   :  { %v823_v55 = vpop.xlane.xlu1 %822 }
 0x367   :  { %4301 = vrcp.f32 %v823_v55 }
 0x370   :  { %v4300_v56 = vpop.eup %4299 }
 0x371   :  { %v854_v57 = vmul.f32 %v4300_v56, %v4576_v8 }
 0x373   :  { %4089 = vmatmul.mubr.msk.f32.vlgmr.msra.gmra.mxu1 %vm772_vm3, %v854_v57 }
 0x374   :  { %v4302_v58 = vpop.eup %4301  ;;  %4097 = vmatpush3.msra.mxu1 %v1090_v51  ;;  %4098 = vmatprep.mubr.msk.f32.mxu1 %vm4366_vm1, %v4363_v14 }
 0x375   :  { %v853_v22 = vmul.f32 %v4302_v58, %v4580_v13  ;;  %4106 = vmatprep.subr.mxu1 %v4363_v14 }
 0x377   :  { %4084 = vmatmul.mubr.msk.f32.vlgmr.msra.gmra.mxu0 %vm772_vm3, %v853_v22 }
 0x378   :  { %4092 = vmatpush3.msra.mxu0 %v1014_v50  ;;  %4093 = vmatprep.mubr.msk.f32.mxu0 %vm4366_vm1, %v4363_v14 }
 0x379   :  { %4101 = vmatprep.subr.mxu0 %v4363_v14 }
 0x3b2   :  { %v829_v23 = vpop.xlane.xlu1 %828 }
 0x3b3   :  { %4303 = vrcp.f32 %v829_v23 }
 0x3b6   :  { %v832_v59 = vpop.xlane.xlu0 %831 }
 0x3b7   :  { %4305 = vrcp.f32 %v832_v59 }
 0x3ba   :  { %v835_v60 = vpop.xlane.xlu1 %834 }
 0x3bb   :  { %4307 = vrcp.f32 %v835_v60 }
 0x3be   :  { %v838_v61 = vpop.xlane.xlu0 %837 }
 0x3bf   :  { %4309 = vrcp.f32 %v838_v61 }
 0x3c0   :  { %v4304_v62 = vpop.eup %4303 }
 0x3c1   :  { %v855_v63 = vmul.f32 %v4304_v62, %v4288_v32 }
 0x3c2   :  { %v841_v0 = vpop.xlane.xlu1 %840 }
 0x3c3   :  { %4311 = vrcp.f32 %v841_v0  ;;  %4094 = vmatmul.mubr.msk.f32.vlgmr.msra.gmra.mxu0 %vm772_vm3, %v855_v63 }
 0x3c4   :  { %v4306_v1 = vpop.eup %4305  ;;  %4102 = vmatpush3.msra.mxu0 %v1166_v52  ;;  %4103 = vmatprep.mubr.msk.f32.mxu0 %vm4366_vm1, %v4363_v14  ;;  %v1502_v52 = vsub.s32 1, %v4447_v9 }
 0x3c5   :  { %v856_v3 = vmul.f32 %v4306_v1, %v4290_v38  ;;  %4111 = vmatprep.subr.mxu0 %v4363_v14 }
 0x3c6   :  { %v844_v4 = vpop.xlane.xlu0 %843  ;;  %v1394_v15 = vpop.permute.xlu1 %1393 }
 0x3c7   :  { %4313 = vrcp.f32 %v844_v4  ;;  %4099 = vmatmul.mubr.msk.f32.vlgmr.msra.gmra.mxu1 %vm772_vm3, %v856_v3 }
 0x3c8   :  { %v4308_v5 = vpop.eup %4307  ;;  %4107 = vmatpush3.msra.mxu1 %v1242_v53  ;;  %4108 = vmatprep.mubr.msk.f32.mxu1 %vm4366_vm1, %v4363_v14  ;;  %v1503_v53 = vrot.slane %v4453_v11, %v1502_v52 }
 0x3c9   :  { %v857_v6 = vmul.f32 %v4308_v5, %v4292_v42  ;;  %4116 = vmatprep.subr.mxu1 %v4363_v14 }
 0x3ca   :  { %v1318_v8 = vpop.permute.xlu0 %1317 }
 0x3cb   :  { %4104 = vmatmul.mubr.msk.f32.vlgmr.msra.gmra.mxu0 %vm772_vm3, %v857_v6  ;;  %v32_v6 = vld [vmem:[%s5052_s1 + $0x50] sm:$0xff] }
 0x3cc   :  { %v4310_v12 = vpop.eup %4309  ;;  %4112 = vmatpush3.msra.mxu0 %v1318_v8  ;;  %4113 = vmatprep.mubr.msk.f32.mxu0 %vm4366_vm1, %v4363_v14  ;;  %v31_v8 = vld [vmem:[%s5052_s1 + $0x48] sm:$0xff] }
 0x3cd   :  { %v858_v13 = vmul.f32 %v4310_v12, %v4294_v44  ;;  %4121 = vmatprep.subr.msk.mxu0 %vm41_vm0, %v29_v27  ;;  %v30_v12 = vld [vmem:[%s5052_s1 + $0x40] sm:$0xff] }
 0x3cf   :  { %4109 = vmatmul.mubr.msk.f32.vlgmr.msra.gmra.mxu1 %vm772_vm3, %v858_v13 }
 0x3d0   :  { %v4312_v16 = vpop.eup %4311  ;;  %4117 = vmatpush3.msra.mxu1 %v1394_v15  ;;  %4118 = vmatprep.mubr.msk.f32.mxu1 %vm4366_vm1, %v4363_v14 }
 0x3d1   :  { %v859_v17 = vmul.f32 %v4312_v16, %v4590_v46 }
 0x3d3   :  { %4114 = vmatmul.mubr.msk.f32.vlgmr.msra.gmra.mxu0 %vm772_vm3, %v859_v17 }
 0x3d4   :  { %v4314_v18 = vpop.eup %4313  ;;  %4122 = vmatpush3.xpose.msk.msra.mxu0 %vm41_vm0, %v29_v27 }
 0x3d5   :  { %v860_v19 = vmul.f32 %v4314_v18, %v4594_v48  ;;  %4123 = vmatprep.subr.msk.mxu0 %vm41_vm0, %v28_v30 }
 0x3d7   :  { %4119 = vmatmul.mubr.msk.f32.vlgmr.msra.gmra.mxu1 %vm772_vm3, %v860_v19 }
 0x3d8   :  { %4124 = vmatpush3.xpose.msk.msra.mxu0 %vm41_vm0, %v28_v30 }
 0x433   :  { %v1009_v20 = vpop.f32.mrf.mxu1 }
 0x435   :  { %v4090_v21 = vpop.f32.mrf.mxu1 }
 0x436   :  { %v1628_v21 = vsub.s32 3, %v4447_v9 }
 0x437   :  { %v933_v24 = vpop.f32.mrf.mxu0 }
 0x438   :  { %v1629_v27 = vrot.slane %v4453_v11, %v1628_v21 }
 0x439   :  { %v4085_v25 = vpop.f32.mrf.mxu0 }
 0x483   :  { %v1085_v26 = vpop.f32.mrf.mxu0 }
 0x484   :  { %1471 = vrot.lane.b32.xlu0 %v1085_v26, %s4370_s17 }
 0x485   :  { %v4095_v28 = vpop.f32.mrf.mxu0 }
 0x487   :  { %v1161_v29 = vpop.f32.mrf.mxu1 }
 0x488   :  { %1473 = vrot.lane.b32.xlu1 %v1161_v29, %s4370_s17 }
 0x489   :  { %v4100_v31 = vpop.f32.mrf.mxu1 }
 0x48b   :  { %v1237_v32 = vpop.f32.mrf.mxu0 }
 0x48c   :  { %1479 = vrot.lane.b32.xlu0 %v1237_v32, %s4371_s20 }
 0x48d   :  { %v4105_v33 = vpop.f32.mrf.mxu0 }
 0x48f   :  { %v1313_v34 = vpop.f32.mrf.mxu1 }
 0x490   :  { %1481 = vrot.lane.b32.xlu1 %v1313_v34, %s4371_s20  ;;  %v35_v34 = vld [vmem:[%s5052_s1 + $0x68] sm:$0xff] }
 0x491   :  { %v4110_v35 = vpop.f32.mrf.mxu1  ;;  %4139 = vmatprep.subr.msk.mxu0 %vm1735_vm5, %v35_v34 }
 0x492   :  { %v34_v35 = vld [vmem:[%s5052_s1 + $0x60] sm:$0xff] }
 0x493   :  { %v1389_v36 = vpop.f32.mrf.mxu0 }
 0x494   :  { %1487 = vrot.lane.b32.xlu0 %v1389_v36, %s4372_s21  ;;  %v1634_v36 = vsub.s32 6, %v4447_v9 }
 0x495   :  { %v4115_v37 = vpop.f32.mrf.mxu0 }
 0x496   :  { %v1635_v37 = vrot.slane %v4453_v11, %v1634_v36 }
 0x497   :  { %v1465_v38 = vpop.f32.mrf.mxu1 }
 0x498   :  { %1489 = vrot.lane.b32.xlu1 %v1465_v38, %s4372_s21 }
 0x499   :  { %v4120_v39 = vpop.f32.mrf.mxu1 }
 0x4f6   :  { %v1472_v40 = vpop.permute.xlu0 %1471 }
 0x4f7   :  { %v1493_v43 = vsel %vm157_vm2, %v933_v24, %v1472_v40 }
 0x4fa   :  { %v1474_v41 = vpop.permute.xlu1 %1473 }
 0x4fb   :  { %v1494_v48 = vsel %vm157_vm2, %v1009_v20, %v1474_v41  ;;  %v1622_v20 = vsub.s32 2, %v4447_v9 }
 0x4fd   :  { %v1623_v24 = vrot.slane %v4453_v11, %v1622_v20 }
 0x4fe   :  { %v1480_v42 = vpop.permute.xlu0 %1479 }
 0x4ff   :  { %v1495_v44 = vsel %vm772_vm3, %v1493_v43, %v1480_v42 }
 0x502   :  { %v1482_v45 = vpop.permute.xlu1 %1481 }
 0x503   :  { %v1496_v49 = vsel %vm772_vm3, %v1494_v48, %v1482_v45 }
 0x506   :  { %v1488_v46 = vpop.permute.xlu0 %1487 }
 0x507   :  { %v1498_v47 = vsel %vm1497_vm4, %v1495_v44, %v1488_v46  ;;  %v1733_v44 = vsub.s32 7, %v4447_v9 }
 0x508   :  { %4125 = vmatprep.mubr.msk.f32.mxu0 %vm41_vm0, %v1498_v47 }
 0x509   :  { %v1734_v45 = vrot.slane %v4453_v11, %v1733_v44 }
 0x50a   :  { %v1490_v50 = vpop.permute.xlu1 %1489 }
 0x50b   :  { %v1499_v51 = vsel %vm1497_vm4, %v1496_v49, %v1490_v50 }
 0x50c   :  { %4126 = vmatmul.mubr.msk.f32.vlgmr.msra.gmra.mxu0 %vm41_vm0, %v1499_v51 }
 0x50d   :  { %4140 = vmatpush3.xpose.msk.msra.mxu0 %vm1735_vm5, %v35_v34 }
 0x50e   :  { %4141 = vmatprep.subr.msk.mxu0 %vm1735_vm5, %v34_v35 }
 0x511   :  { %4142 = vmatpush3.xpose.msk.msra.mxu0 %vm1735_vm5, %v34_v35 }
 0x5cc   :  { %v4127_v54 = vpop.f32.mrf.mxu0 }
 0x5cd   :  { %v1588_v55 = vadd.f32 %v4127_v54, %v1503_v53 }
 0x5ce   :  { %v1582_v56 = vpop.f32.mrf.mxu0 }
 0x5cf   :  { %v1583_v57 = vadd.f32 %v1582_v56, %v1503_v53  ;;  %v1592_v58 = vadd.f32 %v1588_v55, %v4443_v7 }
 0x5d1   :  { %v1596_v22 = vsel %vm41_vm0, %v1592_v58, 0.0  ;;  %v1591_v23 = vadd.f32 %v1583_v57, %v4414_v2  ;;  %v33_v2 = vld [vmem:[%s5052_s1 + $0x58] sm:$0xff] }
 0x5d2   :  { %1597 = vadd.xlane.f32.xlu1 %v1596_v22  ;;  %4128 = vmatprep.subr.msk.mxu1 %vm41_vm0, %v33_v2 }
 0x5d3   :  { %v1593_v59 = vsel %vm41_vm0, %v1591_v23, 0.0  ;;  %4129 = vmatpush3.xpose.msk.msra.mxu1 %vm41_vm0, %v33_v2 }
 0x5d4   :  { %1594 = vadd.xlane.f32.xlu0 %v1593_v59  ;;  %4130 = vmatprep.subr.msk.mxu1 %vm41_vm0, %v32_v6 }
 0x5d7   :  { %4131 = vmatpush3.xpose.msk.msra.mxu1 %vm41_vm0, %v32_v6 }
 0x5d8   :  { %4132 = vmatprep.subr.msk.mxu1 %vm41_vm0, %v31_v8 }
 0x5db   :  { %4133 = vmatpush3.xpose.msk.msra.mxu1 %vm41_vm0, %v31_v8 }
 0x5dc   :  { %4134 = vmatprep.subr.msk.mxu1 %vm41_vm0, %v30_v12 }
 0x5df   :  { %4135 = vmatpush3.xpose.msk.msra.mxu1 %vm41_vm0, %v30_v12 }
 0x5e0   :  { %4161 = vmatprep.subr.mxu1 %v4363_v14 }
 0x65b   :  { %v1598_v60 = vpop.xlane.xlu1 %1597 }
 0x65c   :  { %v1601_v61 = vmul.f32 0.0625, %v1598_v60 }
 0x65d   :  { %v1595_v62 = vpop.xlane.xlu0 %1594 }
 0x65e   :  { %v1600_v63 = vmul.f32 0.0625, %v1595_v62  ;;  %v1603_v0 = vsub.f32 %v1592_v58, %v1601_v61 }
 0x660   :  { %v1602_v1 = vsub.f32 %v1591_v23, %v1600_v63  ;;  %v1605_v5 = vmul.f32 %v1603_v0, %v1603_v0  ;;  %v3853_v63 = vld [vmem:[%s5052_s1 + $0x98] sm:$0xff] }
 0x661   :  { %4146 = vmatprep.subr.msk.mxu0 %vm41_vm0, %v3853_v63 }
 0x662   :  { %v1604_v3 = vmul.f32 %v1602_v1, %v1602_v1  ;;  %v1609_v7 = vsel %vm41_vm0, %v1605_v5, 0.0  ;;  %v3848_v5 = vld [vmem:[%s5052_s1 + $0x70] sm:$0xff] }
 0x664   :  { %v1606_v4 = vsel %vm41_vm0, %v1604_v3, 0.0  ;;  %v3850_v3 = vld [vmem:[%s5052_s1 + $0x80] sm:$0xff] }
 0x665   :  { %1607 = vadd.xlane.f32.xlu0 %v1606_v4  ;;  %v3849_v4 = vld [vmem:[%s5052_s1 + $0x78] sm:$0xff] }
 0x669   :  { %1610 = vadd.xlane.f32.xlu0 %v1609_v7 }
 0x6ee   :  { %v1608_v13 = vpop.xlane.xlu0 %1607 }
 0x6ef   :  { %v1612_v15 = vmul.f32 0.0625, %v1608_v13 }
 0x6f1   :  { %v1614_v16 = vadd.f32 1e-05, %v1612_v15  ;;  %v1853_v15 = vsub.s32 4, %v4447_v9 }
 0x6f2   :  { %v1611_v17 = vpop.xlane.xlu0 %1610 }
 0x6f3   :  { %4315 = vrsqrt.f32 %v1614_v16  ;;  %v1613_v18 = vmul.f32 0.0625, %v1611_v17  ;;  %v1854_v17 = vrot.slane %v4453_v11, %v1853_v15 }
 0x6f5   :  { %v1615_v19 = vadd.f32 1e-05, %v1613_v18  ;;  %v1859_v18 = vsub.s32 5, %v4447_v9 }
 0x6f7   :  { %4317 = vrsqrt.f32 %v1615_v19 }
 0x700   :  { %v4316_v25 = vpop.eup %4315 }
 0x701   :  { %v1618_v26 = vmul.f32 %v4316_v25, %v1602_v1  ;;  %v3851_v1 = vld [vmem:[%s5052_s1 + $0x88] sm:$0xff] }
 0x703   :  { %v1624_v28 = vmul.f32 %v1623_v24, %v1618_v26 }
 0x704   :  { %v4318_v29 = vpop.eup %4317 }
 0x705   :  { %v1619_v30 = vmul.f32 %v4318_v29, %v1603_v0  ;;  %v1630_v31 = vadd.f32 %v1629_v27, %v1624_v28  ;;  %v3852_v0 = vld [vmem:[%s5052_s1 + $0x90] sm:$0xff] }
 0x707   :  { %v1625_v32 = vmul.f32 %v1623_v24, %v1619_v30  ;;  %4136 = vmatprep.mubr.msk.f32.mxu1 %vm41_vm0, %v1630_v31 }
 0x709   :  { %v1631_v33 = vadd.f32 %v1629_v27, %v1625_v32  ;;  %v1860_v27 = vrot.slane %v4453_v11, %v1859_v18 }
 0x70b   :  { %4137 = vmatmul.mubr.msk.f32.vlgmr.msra.gmra.mxu1 %vm41_vm0, %v1631_v33 }
 0x70c   :  { %4163 = vmatprep.mubr.msk.f32.mxu1 %vm4366_vm1, %v4363_v14 }
 0x7cb   :  { %v4138_v38 = vpop.f32.mrf.mxu1 }
 0x7cc   :  { %v1726_v39 = vadd.f32 %v4138_v38, %v1635_v37 }
 0x7cd   :  { %v1720_v40 = vpop.f32.mrf.mxu1 }
 0x7ce   :  { %v1721_v41 = vadd.f32 %v1720_v40, %v1635_v37  ;;  %v1730_v43 = vmax.f32 %v1726_v39, 0.0 }
 0x7d0   :  { %v1729_v42 = vmax.f32 %v1721_v41, 0.0 }
 0x7d2   :  { %4143 = vmatprep.mubr.msk.f32.mxu0 %vm1735_vm5, %v1729_v42 }
 0x7d3   :  { %4144 = vmatmul.mubr.msk.f32.vlgmr.msra.gmra.mxu0 %vm1735_vm5, %v1730_v43 }
 0x7d4   :  { %4147 = vmatpush3.xpose.msk.msra.mxu0 %vm41_vm0, %v3853_v63 }
 0x7d5   :  { %4148 = vmatprep.subr.msk.mxu0 %vm41_vm0, %v3852_v0 }
 0x7d8   :  { %4149 = vmatpush3.xpose.msk.msra.mxu0 %vm41_vm0, %v3852_v0 }
 0x7d9   :  { %4150 = vmatprep.subr.msk.mxu0 %vm41_vm0, %v3851_v1 }
 0x7dc   :  { %4151 = vmatpush3.xpose.msk.msra.mxu0 %vm41_vm0, %v3851_v1 }
 0x7dd   :  { %4152 = vmatprep.subr.msk.mxu0 %vm41_vm0, %v3850_v3 }
 0x7e0   :  { %4153 = vmatpush3.xpose.msk.msra.mxu0 %vm41_vm0, %v3850_v3 }
 0x7e1   :  { %4154 = vmatprep.subr.msk.mxu0 %vm41_vm0, %v3849_v4 }
 0x7e4   :  { %4155 = vmatpush3.xpose.msk.msra.mxu0 %vm41_vm0, %v3849_v4 }
 0x7e5   :  { %4156 = vmatprep.subr.msk.mxu0 %vm41_vm0, %v3848_v5 }
 0x7e8   :  { %4157 = vmatpush3.xpose.msk.msra.mxu0 %vm41_vm0, %v3848_v5 }
 0x7e9   :  { %4191 = vmatprep.subr.mxu0 %v4363_v14 }
 0x893   :  { %v4145_v46 = vpop.f32.mrf.mxu0 }
 0x894   :  { %v1820_v47 = vadd.f32 %v4145_v46, %v1734_v45 }
 0x895   :  { %v1814_v48 = vpop.f32.mrf.mxu0 }
 0x896   :  { %v1815_v49 = vadd.f32 %v1814_v48, %v1734_v45  ;;  %v1824_v50 = vadd.f32 %v1820_v47, %v1631_v33 }
 0x898   :  { %v1828_v51 = vsel %vm41_vm0, %v1824_v50, 0.0  ;;  %v1823_v53 = vadd.f32 %v1815_v49, %v1630_v31  ;;  %v4773_v31 = vld [vmem:[%s5054_s2 + $0x8] sm:$0xff] }
 0x899   :  { %1829 = vadd.xlane.f32.xlu0 %v1828_v51  ;;  %v1883_v11 = vrot.slane %v4773_v31, %v39_v10 }
 0x89a   :  { %v1825_v54 = vsel %vm41_vm0, %v1823_v53, 0.0 }
 0x89b   :  { %1826 = vadd.xlane.f32.xlu1 %v1825_v54 }
 0x922   :  { %v1830_v55 = vpop.xlane.xlu0 %1829 }
 0x923   :  { %v1832_v56 = vmul.f32 0.0625, %v1830_v55 }
 0x924   :  { %v1827_v57 = vpop.xlane.xlu1 %1826 }
 0x925   :  { %v1834_v58 = vsub.f32 %v1824_v50, %v1832_v56  ;;  %v1831_v22 = vmul.f32 0.0625, %v1827_v57 }
 0x927   :  { %v1833_v23 = vsub.f32 %v1823_v53, %v1831_v22  ;;  %v1836_v59 = vmul.f32 %v1834_v58, %v1834_v58 }
 0x929   :  { %v1840_v60 = vsel %vm41_vm0, %v1836_v59, 0.0  ;;  %v1835_v61 = vmul.f32 %v1833_v23, %v1833_v23 }
 0x92a   :  { %1841 = vadd.xlane.f32.xlu0 %v1840_v60 }
 0x92b   :  { %v1837_v62 = vsel %vm41_vm0, %v1835_v61, 0.0 }
 0x92c   :  { %1838 = vadd.xlane.f32.xlu1 %v1837_v62 }
 0x9b3   :  { %v1842_v7 = vpop.xlane.xlu0 %1841 }
 0x9b4   :  { %v1844_v2 = vmul.f32 0.0625, %v1842_v7 }
 0x9b5   :  { %v1839_v6 = vpop.xlane.xlu1 %1838 }
 0x9b6   :  { %v1846_v8 = vadd.f32 1e-05, %v1844_v2  ;;  %v1843_v12 = vmul.f32 0.0625, %v1839_v6 }
 0x9b8   :  { %4319 = vrsqrt.f32 %v1846_v8  ;;  %v1845_v13 = vadd.f32 1e-05, %v1843_v12 }
 0x9ba   :  { %4321 = vrsqrt.f32 %v1845_v13 }
 0x9c5   :  { %v4320_v16 = vpop.eup %4319 }
 0x9c6   :  { %v1850_v19 = vmul.f32 %v4320_v16, %v1834_v58 }
 0x9c7   :  { %v4322_v24 = vpop.eup %4321 }
 0x9c8   :  { %v1849_v25 = vmul.f32 %v4322_v24, %v1833_v23  ;;  %v1856_v26 = vmul.f32 %v1854_v17, %v1850_v19 }
 0x9ca   :  { %v1855_v28 = vmul.f32 %v1854_v17, %v1849_v25  ;;  %v4762_v30 = vadd.f32 %v1860_v27, %v1856_v26 }
 0x9cc   :  { %v4760_v29 = vadd.f32 %v1860_v27, %v1855_v28 }
 0x9ce   :  { %4158 = vmatprep.mubr.msk.f32.mxu0 %vm41_vm0, %v4760_v29 }
 0x9cf   :  { %4159 = vmatmul.mubr.msk.f32.vlgmr.msra.gmra.mxu0 %vm41_vm0, %v4762_v30 }
 0x9d0   :  { %4193 = vmatprep.mubr.msk.f32.mxu0 %vm4366_vm1, %v4363_v14 }
 0xa8f   :  { %v4160_v32 = vpop.f32.mrf.mxu0 }
 0xa90   :  { %v4778_v33 = vadd.f32 %v4160_v32, %v1883_v11 }
 0xa91   :  { %v1974_v34 = vpop.f32.mrf.mxu0 }
 0xa92   :  { %v4780_v35 = vadd.f32 %v1974_v34, %v1883_v11  ;;  %1987 = vrot.lane.b32.xlu0 %v4778_v33, %s4365_s11 }
 0xa94   :  { %1985 = vrot.lane.b32.xlu1 %v4780_v35, %s4365_s11 }
 0xa96   :  { %1993 = vrot.lane.b32.xlu0 %v4780_v35, %s4367_s12 }
 0xa98   :  { %1989 = vrot.lane.b32.xlu1 %v4780_v35, %s4364_s0 }
 0xa9a   :  { %1997 = vrot.lane.b32.xlu0 %v4780_v35, %s4368_s13 }
 0xa9c   :  { %1991 = vrot.lane.b32.xlu1 %v4778_v33, %s4364_s0 }
 0xaa0   :  { %1995 = vrot.lane.b32.xlu1 %v4778_v33, %s4367_s12 }
 0xaa4   :  { %2073 = vrot.lane.b32.xlu1 %v4778_v33, %s4368_s13 }
 0xb04   :  { %v4798_v10 = vpop.permute.xlu0 %1987 }
 0xb05   :  { %2225 = vrot.lane.b32.xlu1 %v4798_v10, %s4368_s13 }
 0xb06   :  { %v4802_v37 = vpop.permute.xlu1 %1985 }
 0xb07   :  { %2149 = vrot.lane.b32.xlu0 %v4802_v37, %s4368_s13 }
 0xb08   :  { %v4806_v38 = vpop.permute.xlu0 %1993 }
 0xb0a   :  { %v4808_v39 = vpop.permute.xlu1 %1989 }
 0xb0b   :  { %2301 = vrot.lane.b32.xlu0 %v4808_v39, %s4368_s13 }
 0xb0c   :  { %v1998_v40 = vpop.permute.xlu0 %1997 }
 0xb0d   :  { %4162 = vmatpush3.xpose.msk.msra.mxu1 %vm157_vm2, %v1998_v40 }
 0xb0e   :  { %v4813_v41 = vpop.permute.xlu1 %1991  ;;  %4166 = vmatprep.subr.mxu1 %v4363_v14 }
 0xb0f   :  { %2453 = vrot.lane.b32.xlu0 %v4806_v38, %s4368_s13  ;;  %2377 = vrot.lane.b32.xlu1 %v4813_v41, %s4368_s13 }
 0xb10   :  { %4164 = vmatmul.mubr.msk.f32.vlgmr.msra.gmra.mxu1 %vm157_vm2, %v4780_v35 }
 0xb11   :  { %4168 = vmatprep.mubr.msk.f32.mxu1 %vm4366_vm1, %v4363_v14 }
 0xb12   :  { %v4824_v42 = vpop.permute.xlu1 %1995 }
 0xb13   :  { %2529 = vrot.lane.b32.xlu1 %v4824_v42, %s4368_s13 }
 0xb16   :  { %v2074_v43 = vpop.permute.xlu1 %2073 }
 0xb17   :  { %4167 = vmatpush3.xpose.msk.msra.mxu1 %vm157_vm2, %v2074_v43 }
 0xb18   :  { %4171 = vmatprep.subr.mxu1 %v4363_v14 }
 0xb1a   :  { %4169 = vmatmul.mubr.msk.f32.vlgmr.msra.gmra.mxu1 %vm157_vm2, %v4778_v33 }
 0xb1b   :  { %4173 = vmatprep.mubr.msk.f32.mxu1 %vm4366_vm1, %v4363_v14 }
 0xb77   :  { %v2226_v46 = vpop.permute.xlu1 %2225 }
 0xb79   :  { %v2150_v45 = vpop.permute.xlu0 %2149 }
 0xb7a   :  { %4172 = vmatpush3.xpose.msk.msra.mxu1 %vm157_vm2, %v2150_v45 }
 0xb7b   :  { %4176 = vmatprep.subr.mxu1 %v4363_v14 }
 0xb7d   :  { %v2302_v47 = vpop.permute.xlu0 %2301  ;;  %4174 = vmatmul.mubr.msk.f32.vlgmr.msra.gmra.mxu1 %vm157_vm2, %v4802_v37 }
 0xb7e   :  { %4177 = vmatpush3.xpose.msk.msra.mxu1 %vm157_vm2, %v2226_v46  ;;  %4178 = vmatprep.mubr.msk.f32.mxu1 %vm4366_vm1, %v4363_v14 }
 0xb7f   :  { %4181 = vmatprep.subr.mxu1 %v4363_v14 }
 0xb81   :  { %v2454_v48 = vpop.permute.xlu0 %2453  ;;  %4179 = vmatmul.mubr.msk.f32.vlgmr.msra.gmra.mxu1 %vm157_vm2, %v4798_v10  ;;  %v2378_v49 = vpop.permute.xlu1 %2377 }
 0xb82   :  { %4182 = vmatpush3.xpose.msk.msra.mxu1 %vm157_vm2, %v2302_v47  ;;  %4192 = vmatpush3.xpose.msk.msra.mxu0 %vm157_vm2, %v2454_v48 }
 0xb83   :  { %4183 = vmatprep.mubr.msk.f32.mxu1 %vm4366_vm1, %v4363_v14  ;;  %4186 = vmatprep.subr.mxu1 %v4363_v14 }
 0xb84   :  { %4201 = vmatprep.subr.mxu0 %v4363_v14 }
 0xb85   :  { %4184 = vmatmul.mubr.msk.f32.vlgmr.msra.gmra.mxu1 %vm157_vm2, %v4808_v39  ;;  %4194 = vmatmul.mubr.msk.f32.vlgmr.msra.gmra.mxu0 %vm157_vm2, %v4806_v38  ;;  %v2530_v50 = vpop.permute.xlu1 %2529 }
 0xb86   :  { %4187 = vmatpush3.xpose.msk.msra.mxu1 %vm157_vm2, %v2378_v49  ;;  %4188 = vmatprep.mubr.msk.f32.mxu1 %vm4366_vm1, %v4363_v14 }
 0xb87   :  { %4196 = vmatprep.subr.mxu1 %v4363_v14  ;;  %4203 = vmatprep.mubr.msk.f32.mxu0 %vm4366_vm1, %v4363_v14 }
 0xb89   :  { %4189 = vmatmul.mubr.msk.f32.vlgmr.msra.gmra.mxu1 %vm157_vm2, %v4813_v41 }
 0xb8a   :  { %4197 = vmatpush3.xpose.msk.msra.mxu1 %vm157_vm2, %v2530_v50  ;;  %4198 = vmatprep.mubr.msk.f32.mxu1 %vm4366_vm1, %v4363_v14 }
 0xb8b   :  { %4206 = vmatprep.subr.mxu1 %v4363_v14 }
 0xb8d   :  { %4199 = vmatmul.mubr.msk.f32.vlgmr.msra.gmra.mxu1 %vm157_vm2, %v4824_v42 }
 0xb8e   :  { %4208 = vmatprep.mubr.msk.f32.mxu1 %vm4366_vm1, %v4363_v14 }
 0xbd0   :  { %v2069_v51 = vpop.f32.mrf.mxu1 }
 0xbd1   :  { %v2605_v53 = vmul.f32 0.5, %v2069_v51 }
 0xbd2   :  { %v4165_v54 = vpop.f32.mrf.mxu1 }
 0xbd3   :  { %v2613_v55 = vsel %vm772_vm3, %v2605_v53, -inf }
 0xbd4   :  { %2614 = vmax.xlane.f32.xlu0 %v2613_v55 }
 0xbda   :  { %v2145_v56 = vpop.f32.mrf.mxu1 }
 0xbdb   :  { %v2606_v57 = vmul.f32 0.5, %v2145_v56 }
 0xbdc   :  { %v4170_v58 = vpop.f32.mrf.mxu1 }
 0xbdd   :  { %v2616_v22 = vsel %vm772_vm3, %v2606_v57, -inf }
 0xbde   :  { %2617 = vmax.xlane.f32.xlu1 %v2616_v22 }
 0xc3d   :  { %v2221_v23 = vpop.f32.mrf.mxu1 }
 0xc3e   :  { %v2607_v59 = vmul.f32 0.5, %v2221_v23 }
 0xc3f   :  { %v4175_v60 = vpop.f32.mrf.mxu1 }
 0xc40   :  { %v2619_v61 = vsel %vm772_vm3, %v2607_v59, -inf }
 0xc41   :  { %2620 = vmax.xlane.f32.xlu0 %v2619_v61  ;;  %v2297_v62 = vpop.f32.mrf.mxu1 }
 0xc42   :  { %v2608_v63 = vmul.f32 0.5, %v2297_v62 }
 0xc43   :  { %v4180_v0 = vpop.f32.mrf.mxu1 }
 0xc44   :  { %v2622_v1 = vsel %vm772_vm3, %v2608_v63, -inf }
 0xc45   :  { %v2525_v3 = vpop.f32.mrf.mxu0  ;;  %2623 = vmax.xlane.f32.xlu0 %v2622_v1  ;;  %v2373_v4 = vpop.f32.mrf.mxu1 }
 0xc46   :  { %v2609_v5 = vmul.f32 0.5, %v2373_v4  ;;  %v2611_v6 = vmul.f32 0.5, %v2525_v3 }
 0xc47   :  { %v4185_v7 = vpop.f32.mrf.mxu1  ;;  %v4195_v2 = vpop.f32.mrf.mxu0 }
 0xc48   :  { %v2625_v8 = vsel %vm772_vm3, %v2609_v5, -inf  ;;  %v2631_v17 = vsel %vm772_vm3, %v2611_v6, -inf }
 0xc49   :  { %2626 = vmax.xlane.f32.xlu1 %v2625_v8  ;;  %v2449_v12 = vpop.f32.mrf.mxu1 }
 0xc4a   :  { %v2610_v13 = vmul.f32 0.5, %v2449_v12 }
 0xc4b   :  { %v4190_v16 = vpop.f32.mrf.mxu1 }
 0xc4c   :  { %v2628_v19 = vsel %vm772_vm3, %v2610_v13, -inf }
 0xc4d   :  { %2632 = vmax.xlane.f32.xlu1 %v2631_v17  ;;  %2629 = vmax.xlane.f32.xlu0 %v2628_v19  ;;  %v2601_v24 = vpop.f32.mrf.mxu1 }
 0xc4e   :  { %v2612_v25 = vmul.f32 0.5, %v2601_v24 }
 0xc4f   :  { %v4200_v26 = vpop.f32.mrf.mxu1 }
 0xc50   :  { %v2634_v27 = vsel %vm772_vm3, %v2612_v25, -inf }
 0xc51   :  { %2635 = vmax.xlane.f32.xlu0 %v2634_v27 }
 0xc5d   :  { %v2615_v32 = vpop.xlane.xlu0 %2614 }
 0xc5e   :  { %2701 = vrot.lane.b32.xlu1 %v4780_v35, %s4369_s14  ;;  %v2637_v34 = vsub.f32 %v2605_v53, %v2615_v32 }
 0xc60   :  { %v2645_v40 = vmul.f32 1.442695, %v2637_v34 }
 0xc62   :  { %2853 = vrot.lane.b32.xlu1 %v4802_v37, %s4369_s14 }
 0xc66   :  { %2929 = vrot.lane.b32.xlu1 %v4798_v10, %s4369_s14 }
 0xc67   :  { %2777 = vrot.lane.b32.xlu0 %v4778_v33, %s4369_s14  ;;  %v2618_v28 = vpop.xlane.xlu1 %2617 }
 0xc68   :  { %v2638_v11 = vsub.f32 %v2606_v57, %v2618_v28 }
 0xc6a   :  { %3081 = vrot.lane.b32.xlu1 %v4813_v41, %s4369_s14  ;;  %v2647_v35 = vmul.f32 1.442695, %v2638_v11 }
 0xc6b   :  { %3005 = vrot.lane.b32.xlu0 %v4808_v39, %s4369_s14 }
 0xc6c   :  { %4323 = vpow2.f32 %v2647_v35 }
 0xc6d   :  { %4325 = vpow2.f32 %v2645_v40 }
 0xc79   :  { %v4890_v37 = vpop.eup %4323 }
 0xc7a   :  { %v2664_v10 = vsel %vm772_vm3, %v4890_v37, 0.0  ;;  %v4894_v33 = vpop.eup %4325 }
 0xc7b   :  { %v2661_v41 = vsel %vm772_vm3, %v4894_v33, 0.0 }
 0xc8a   :  { %2665 = vadd.xlane.f32.xlu0 %v2664_v10 }
 0xc8e   :  { %2662 = vadd.xlane.f32.xlu1 %v2661_v41 }
 0xcca   :  { %v2621_v39 = vpop.xlane.xlu0 %2620 }
 0xccb   :  { %v2639_v43 = vsub.f32 %v2607_v59, %v2621_v39 }
 0xccd   :  { %v2649_v45 = vmul.f32 1.442695, %v2639_v43 }
 0xcce   :  { %v2624_v46 = vpop.xlane.xlu0 %2623 }
 0xccf   :  { %4327 = vpow2.f32 %v2649_v45  ;;  %v2640_v47 = vsub.f32 %v2608_v63, %v2624_v46 }
 0xcd1   :  { %v2651_v48 = vmul.f32 1.442695, %v2640_v47 }
 0xcd2   :  { %v2627_v49 = vpop.xlane.xlu1 %2626 }
 0xcd3   :  { %4329 = vpow2.f32 %v2651_v48  ;;  %v2641_v50 = vsub.f32 %v2609_v5, %v2627_v49 }
 0xcd5   :  { %v2653_v58 = vmul.f32 1.442695, %v2641_v50 }
 0xcd6   :  { %v2630_v51 = vpop.xlane.xlu0 %2629  ;;  %v2633_v53 = vpop.xlane.xlu1 %2632 }
 0xcd7   :  { %v2642_v54 = vsub.f32 %v2610_v13, %v2630_v51  ;;  %v2643_v55 = vsub.f32 %v2611_v6, %v2633_v53 }
 0xcd9   :  { %v2655_v56 = vmul.f32 1.442695, %v2642_v54  ;;  %v2657_v57 = vmul.f32 1.442695, %v2643_v55 }
 0xcda   :  { %v2636_v22 = vpop.xlane.xlu0 %2635  ;;  %v2702_v23 = vpop.permute.xlu1 %2701 }
 0xcdb   :  { %4331 = vpow2.f32 %v2655_v56  ;;  %v2644_v60 = vsub.f32 %v2612_v25, %v2636_v22  ;;  %4202 = vmatpush3.msra.mxu0 %v2702_v23  ;;  %v3855_v22 = vld [vmem:[%s5052_s1 + $0xa8] sm:$0xff] }
 0xcdc   :  { %v4328_v59 = vpop.eup %4327  ;;  %4333 = vpow2.f32 %v2657_v57  ;;  %4211 = vmatprep.subr.mxu0 %v4363_v14 }
 0xcdd   :  { %v2659_v61 = vmul.f32 1.442695, %v2644_v60  ;;  %v2667_v62 = vsel %vm772_vm3, %v4328_v59, 0.0  ;;  %4335 = vpow2.f32 %v2653_v58  ;;  %v3854_v60 = vld [vmem:[%s5052_s1 + $0xa0] sm:$0xff] }
 0xcde   :  { %2668 = vadd.xlane.f32.xlu1 %v2667_v62  ;;  %v2778_v63 = vpop.permute.xlu0 %2777  ;;  %v2854_v13 = vpop.permute.xlu1 %2853 }
 0xcdf   :  { %4337 = vpow2.f32 %v2659_v61  ;;  %4207 = vmatpush3.msra.mxu1 %v2778_v63 }
 0xce0   :  { %v4330_v0 = vpop.eup %4329  ;;  %4216 = vmatprep.subr.mxu1 %v4363_v14 }
 0xce1   :  { %v2670_v1 = vsel %vm772_vm3, %v4330_v0, 0.0 }
 0xce2   :  { %2671 = vadd.xlane.f32.xlu0 %v2670_v1  ;;  %v2930_v16 = vpop.permute.xlu1 %2929  ;;  %v3006_v17 = vpop.permute.xlu0 %3005 }
 0xce6   :  { %v3082_v19 = vpop.permute.xlu1 %3081 }
 0xce8   :  { %v4332_v3 = vpop.eup %4331 }
 0xce9   :  { %v4902_v4 = vpop.eup %4333  ;;  %v2676_v5 = vsel %vm772_vm3, %v4332_v3, 0.0 }
 0xcea   :  { %2677 = vadd.xlane.f32.xlu0 %v2676_v5  ;;  %v2679_v7 = vsel %vm772_vm3, %v4902_v4, 0.0  ;;  %v4336_v2 = vpop.eup %4335 }
 0xceb   :  { %2680 = vadd.xlane.f32.xlu1 %v2679_v7  ;;  %v2673_v12 = vsel %vm772_vm3, %v4336_v2, 0.0 }
 0xcec   :  { %v4338_v6 = vpop.eup %4337 }
 0xced   :  { %v2682_v8 = vsel %vm772_vm3, %v4338_v6, 0.0 }
 0xcee   :  { %2683 = vadd.xlane.f32.xlu0 %v2682_v8 }
 0xcef   :  { %2674 = vadd.xlane.f32.xlu1 %v2673_v12 }
 0xd00   :  { %3233 = vrot.lane.b32.xlu1 %v4824_v42, %s4369_s14 }
 0xd04   :  { %3157 = vrot.lane.b32.xlu0 %v4806_v38, %s4369_s14 }
 0xd13   :  { %v2666_v24 = vpop.xlane.xlu0 %2665 }
 0xd14   :  { %4339 = vrcp.f32 %v2666_v24 }
 0xd17   :  { %v2663_v25 = vpop.xlane.xlu1 %2662 }
 0xd18   :  { %4341 = vrcp.f32 %v2663_v25 }
 0xd21   :  { %v4340_v26 = vpop.eup %4339 }
 0xd22   :  { %v2694_v27 = vmul.f32 %v4340_v26, %v4890_v37 }
 0xd24   :  { %4209 = vmatmul.mubr.msk.f32.vlgmr.msra.gmra.mxu1 %vm772_vm3, %v2694_v27  ;;  %v3342_v27 = vrot.slane %v4773_v31, %v1502_v52 }
 0xd25   :  { %v4342_v28 = vpop.eup %4341  ;;  %4217 = vmatpush3.msra.mxu1 %v2930_v16  ;;  %4218 = vmatprep.mubr.msk.f32.mxu1 %vm4366_vm1, %v4363_v14 }
 0xd26   :  { %v2693_v38 = vmul.f32 %v4342_v28, %v4894_v33  ;;  %4226 = vmatprep.subr.mxu1 %v4363_v14 }
 0xd28   :  { %4204 = vmatmul.mubr.msk.f32.vlgmr.msra.gmra.mxu0 %vm772_vm3, %v2693_v38 }
 0xd29   :  { %4212 = vmatpush3.msra.mxu0 %v2854_v13  ;;  %4213 = vmatprep.mubr.msk.f32.mxu0 %vm4366_vm1, %v4363_v14 }
 0xd2a   :  { %4221 = vmatprep.subr.mxu0 %v4363_v14 }
 0xd67   :  { %v2669_v42 = vpop.xlane.xlu1 %2668 }
 0xd68   :  { %4343 = vrcp.f32 %v2669_v42 }
 0xd6b   :  { %v2672_v11 = vpop.xlane.xlu0 %2671 }
 0xd6c   :  { %4345 = vrcp.f32 %v2672_v11 }
 0xd73   :  { %v2678_v32 = vpop.xlane.xlu0 %2677 }
 0xd74   :  { %4347 = vrcp.f32 %v2678_v32  ;;  %v2681_v34 = vpop.xlane.xlu1 %2680 }
 0xd75   :  { %v4344_v35 = vpop.eup %4343 }
 0xd76   :  { %v2695_v40 = vmul.f32 %v4344_v35, %v4328_v59 }
 0xd77   :  { %v2684_v37 = vpop.xlane.xlu0 %2683 }
 0xd78   :  { %4349 = vrcp.f32 %v2684_v37  ;;  %v2675_v10 = vpop.xlane.xlu1 %2674  ;;  %4214 = vmatmul.mubr.msk.f32.vlgmr.msra.gmra.mxu0 %vm772_vm3, %v2695_v40 }
 0xd79   :  { %v4346_v33 = vpop.eup %4345  ;;  %4351 = vrcp.f32 %v2675_v10  ;;  %4222 = vmatpush3.msra.mxu0 %v3006_v17  ;;  %4223 = vmatprep.mubr.msk.f32.mxu0 %vm4366_vm1, %v4363_v14 }
 0xd7a   :  { %v2696_v41 = vmul.f32 %v4346_v33, %v4330_v0  ;;  %4231 = vmatprep.subr.mxu0 %v4363_v14  ;;  %4353 = vrcp.f32 %v2681_v34 }
 0xd7b   :  { %v3158_v51 = vpop.permute.xlu0 %3157 }
 0xd7c   :  { %4219 = vmatmul.mubr.msk.f32.vlgmr.msra.gmra.mxu1 %vm772_vm3, %v2696_v41  ;;  %v3234_v45 = vpop.permute.xlu1 %3233 }
 0xd7d   :  { %4227 = vmatpush3.msra.mxu1 %v3082_v19  ;;  %4228 = vmatprep.mubr.msk.f32.mxu1 %vm4366_vm1, %v4363_v14 }
 0xd7e   :  { %4236 = vmatprep.subr.mxu1 %v4363_v14 }
 0xd81   :  { %v4348_v39 = vpop.eup %4347 }
 0xd82   :  { %v2698_v43 = vmul.f32 %v4348_v39, %v4332_v3 }
 0xd84   :  { %4229 = vmatmul.mubr.msk.f32.vlgmr.msra.gmra.mxu1 %vm772_vm3, %v2698_v43 }
 0xd85   :  { %v4350_v46 = vpop.eup %4349  ;;  %4237 = vmatpush3.msra.mxu1 %v3234_v45  ;;  %4238 = vmatprep.mubr.msk.f32.mxu1 %vm4366_vm1, %v4363_v14 }
 0xd86   :  { %v4352_v47 = vpop.eup %4351  ;;  %v2700_v48 = vmul.f32 %v4350_v46, %v4338_v6 }
 0xd87   :  { %v2697_v49 = vmul.f32 %v4352_v47, %v4336_v2  ;;  %v4354_v50 = vpop.eup %4353  ;;  %v3858_v47 = vld [vmem:[%s5052_s1 + $0xc0] sm:$0xff] }
 0xd88   :  { %4239 = vmatmul.mubr.msk.f32.vlgmr.msra.gmra.mxu1 %vm772_vm3, %v2700_v48  ;;  %v2699_v53 = vmul.f32 %v4354_v50, %v4902_v4  ;;  %v3857_v48 = vld [vmem:[%s5052_s1 + $0xb8] sm:$0xff] }
 0xd89   :  { %4224 = vmatmul.mubr.msk.f32.vlgmr.msra.gmra.mxu0 %vm772_vm3, %v2697_v49  ;;  %v3856_v49 = vld [vmem:[%s5052_s1 + $0xb0] sm:$0xff] }
 0xd8a   :  { %4232 = vmatpush3.msra.mxu0 %v3158_v51  ;;  %4233 = vmatprep.mubr.msk.f32.mxu0 %vm4366_vm1, %v4363_v14 }
 0xd8b   :  { %4241 = vmatprep.subr.msk.mxu0 %vm41_vm0, %v3855_v22 }
 0xd8d   :  { %4234 = vmatmul.mubr.msk.f32.vlgmr.msra.gmra.mxu0 %vm772_vm3, %v2699_v53 }
 0xd8e   :  { %4242 = vmatpush3.xpose.msk.msra.mxu0 %vm41_vm0, %v3855_v22 }
 0xd8f   :  { %4243 = vmatprep.subr.msk.mxu0 %vm41_vm0, %v3854_v60 }
 0xd92   :  { %4244 = vmatpush3.xpose.msk.msra.mxu0 %vm41_vm0, %v3854_v60 }
 0xde4   :  { %v2849_v54 = vpop.f32.mrf.mxu1 }
 0xde6   :  { %v4210_v55 = vpop.f32.mrf.mxu1 }
 0xde8   :  { %v2773_v56 = vpop.f32.mrf.mxu0 }
 0xdea   :  { %v4205_v57 = vpop.f32.mrf.mxu0 }
 0xdeb   :  { %v3461_v57 = vrot.slane %v4773_v31, %v1622_v20  ;;  %v3861_v20 = vld [vmem:[%s5052_s1 + $0xd8] sm:$0xff] }
 0xdec   :  { %4259 = vmatprep.subr.msk.mxu0 %vm1735_vm5, %v3861_v20 }
 0xe38   :  { %v2925_v58 = vpop.f32.mrf.mxu0 }
 0xe39   :  { %3311 = vrot.lane.b32.xlu0 %v2925_v58, %s4370_s17 }
 0xe3a   :  { %v4215_v23 = vpop.f32.mrf.mxu0 }
 0xe3b   :  { %v3467_v23 = vrot.slane %v4773_v31, %v1628_v21  ;;  %v3860_v21 = vld [vmem:[%s5052_s1 + $0xd0] sm:$0xff] }
 0xe3c   :  { %v3001_v14 = vpop.f32.mrf.mxu1 }
 0xe3d   :  { %3313 = vrot.lane.b32.xlu1 %v3001_v14, %s4370_s17 }
 0xe3e   :  { %v4220_v59 = vpop.f32.mrf.mxu1 }
 0xe44   :  { %v3153_v61 = vpop.f32.mrf.mxu1 }
 0xe45   :  { %3321 = vrot.lane.b32.xlu1 %v3153_v61, %s4371_s20 }
 0xe46   :  { %v4230_v62 = vpop.f32.mrf.mxu1 }
 0xe48   :  { %v3305_v63 = vpop.f32.mrf.mxu1 }
 0xe49   :  { %v3077_v0 = vpop.f32.mrf.mxu0  ;;  %3329 = vrot.lane.b32.xlu1 %v3305_v63, %s4372_s21 }
 0xe4a   :  { %3319 = vrot.lane.b32.xlu0 %v3077_v0, %s4371_s20  ;;  %v4240_v1 = vpop.f32.mrf.mxu1  ;;  %v3473_v0 = vrot.slane %v4773_v31, %v1634_v36 }
 0xe4b   :  { %v4225_v3 = vpop.f32.mrf.mxu0 }
 0xe4d   :  { %v3229_v4 = vpop.f32.mrf.mxu0 }
 0xe4e   :  { %3327 = vrot.lane.b32.xlu0 %v3229_v4, %s4372_s21 }
 0xe4f   :  { %v4235_v5 = vpop.f32.mrf.mxu0 }
 0xeab   :  { %v3312_v2 = vpop.permute.xlu0 %3311 }
 0xeac   :  { %v3333_v12 = vsel %vm157_vm2, %v2773_v56, %v3312_v2 }
 0xeaf   :  { %v3314_v7 = vpop.permute.xlu1 %3313 }
 0xeb0   :  { %v3334_v16 = vsel %vm157_vm2, %v2849_v54, %v3314_v7 }
 0xeb7   :  { %v3322_v6 = vpop.permute.xlu1 %3321 }
 0xeb8   :  { %v3336_v24 = vsel %vm772_vm3, %v3334_v16, %v3322_v6  ;;  %v3572_v6 = vrot.slane %v4773_v31, %v1733_v44 }
 0xebb   :  { %v3330_v13 = vpop.permute.xlu1 %3329 }
 0xebc   :  { %v3320_v8 = vpop.permute.xlu0 %3319  ;;  %v3338_v26 = vsel %vm1497_vm4, %v3336_v24, %v3330_v13 }
 0xebd   :  { %v3335_v17 = vsel %vm772_vm3, %v3333_v12, %v3320_v8 }
 0xec0   :  { %v3328_v19 = vpop.permute.xlu0 %3327 }
 0xec1   :  { %v3337_v25 = vsel %vm1497_vm4, %v3335_v17, %v3328_v19 }
 0xec2   :  { %4245 = vmatprep.mubr.msk.f32.mxu0 %vm41_vm0, %v3337_v25 }
 0xec3   :  { %4246 = vmatmul.mubr.msk.f32.vlgmr.msra.gmra.mxu0 %vm41_vm0, %v3338_v26 }
 0xec4   :  { %4260 = vmatpush3.xpose.msk.msra.mxu0 %vm1735_vm5, %v3861_v20 }
 0xec5   :  { %4261 = vmatprep.subr.msk.mxu0 %vm1735_vm5, %v3860_v21 }
 0xec8   :  { %4262 = vmatpush3.xpose.msk.msra.mxu0 %vm1735_vm5, %v3860_v21 }
 0xf83   :  { %v4247_v28 = vpop.f32.mrf.mxu0 }
 0xf84   :  { %v3427_v38 = vadd.f32 %v4247_v28, %v3342_v27 }
 0xf85   :  { %v3421_v42 = vpop.f32.mrf.mxu0 }
 0xf86   :  { %v3422_v11 = vadd.f32 %v3421_v42, %v3342_v27  ;;  %v3431_v32 = vadd.f32 %v3427_v38, %v4762_v30 }
 0xf88   :  { %v3435_v34 = vsel %vm41_vm0, %v3431_v32, 0.0  ;;  %v3430_v35 = vadd.f32 %v3422_v11, %v4760_v29  ;;  %v3859_v29 = vld [vmem:[%s5052_s1 + $0xc8] sm:$0xff] }
 0xf89   :  { %3436 = vadd.xlane.f32.xlu1 %v3435_v34  ;;  %4248 = vmatprep.subr.msk.mxu1 %vm41_vm0, %v3859_v29 }
 0xf8a   :  { %v3432_v40 = vsel %vm41_vm0, %v3430_v35, 0.0  ;;  %4249 = vmatpush3.xpose.msk.msra.mxu1 %vm41_vm0, %v3859_v29 }
 0xf8b   :  { %3433 = vadd.xlane.f32.xlu0 %v3432_v40  ;;  %4250 = vmatprep.subr.msk.mxu1 %vm41_vm0, %v3858_v47  ;;  %v3700_v40 = vld [vmem:[%s5055_s3] sm:$0xff] }
 0xf8e   :  { %4251 = vmatpush3.xpose.msk.msra.mxu1 %vm41_vm0, %v3858_v47 }
 0xf8f   :  { %4252 = vmatprep.subr.msk.mxu1 %vm41_vm0, %v3857_v48 }
 0xf92   :  { %4253 = vmatpush3.xpose.msk.msra.mxu1 %vm41_vm0, %v3857_v48  ;;  %v3697_v48 = vrot.slane %v4773_v31, %v1859_v18 }
 0xf93   :  { %4254 = vmatprep.subr.msk.mxu1 %vm41_vm0, %v3856_v49 }
 0xf96   :  { %4255 = vmatpush3.xpose.msk.msra.mxu1 %vm41_vm0, %v3856_v49 }
0x1012   :  { %v3437_v37 = vpop.xlane.xlu1 %3436 }
0x1013   :  { %v3439_v10 = vmul.f32 0.0625, %v3437_v37 }
0x1014   :  { %v3434_v33 = vpop.xlane.xlu0 %3433 }
0x1015   :  { %v3438_v41 = vmul.f32 0.0625, %v3434_v33  ;;  %v3441_v39 = vsub.f32 %v3431_v32, %v3439_v10 }
0x1017   :  { %v3440_v52 = vsub.f32 %v3430_v35, %v3438_v41  ;;  %v3443_v46 = vmul.f32 %v3441_v39, %v3441_v39  ;;  %v3701_v35 = vld [vmem:[%s5055_s3 + $0x8] sm:$0xff] }
0x1018   :  { %4266 = vmatprep.subr.msk.mxu0 %vm41_vm0, %v3701_v35 }
0x1019   :  { %v3442_v43 = vmul.f32 %v3440_v52, %v3440_v52  ;;  %v3447_v30 = vsel %vm41_vm0, %v3443_v46, 0.0 }
0x101b   :  { %v3444_v45 = vsel %vm41_vm0, %v3442_v43, 0.0 }
0x101c   :  { %3445 = vadd.xlane.f32.xlu0 %v3444_v45  ;;  %v3691_v45 = vrot.slane %v4773_v31, %v1853_v15 }
0x1020   :  { %3448 = vadd.xlane.f32.xlu0 %v3447_v30 }
0x10a5   :  { %v3446_v50 = vpop.xlane.xlu0 %3445 }
0x10a6   :  { %v3450_v51 = vmul.f32 0.0625, %v3446_v50 }
0x10a8   :  { %v3452_v53 = vadd.f32 1e-05, %v3450_v51 }
0x10a9   :  { %v3449_v54 = vpop.xlane.xlu0 %3448 }
0x10aa   :  { %4355 = vrsqrt.f32 %v3452_v53  ;;  %v3451_v55 = vmul.f32 0.0625, %v3449_v54  ;;  %v3909_v53 = vld [vmem:[%s5056_s4] ss:$0 sm:$0xff] }
0x10ac   :  { %v3453_v56 = vadd.f32 1e-05, %v3451_v55 }
0x10ae   :  { %4357 = vrsqrt.f32 %v3453_v56 }
0x10b7   :  { %v4356_v58 = vpop.eup %4355 }
0x10b8   :  { %v3456_v22 = vmul.f32 %v4356_v58, %v3440_v52 }
0x10ba   :  { %v3462_v14 = vmul.f32 %v3461_v57, %v3456_v22 }
0x10bb   :  { %v4358_v60 = vpop.eup %4357 }
0x10bc   :  { %v3457_v59 = vmul.f32 %v4358_v60, %v3441_v39  ;;  %v3468_v61 = vadd.f32 %v3467_v23, %v3462_v14 }
0x10be   :  { %v3463_v62 = vmul.f32 %v3461_v57, %v3457_v59  ;;  %4256 = vmatprep.mubr.msk.f32.mxu1 %vm41_vm0, %v3468_v61 }
0x10c0   :  { %v3469_v63 = vadd.f32 %v3467_v23, %v3463_v62 }
0x10c2   :  { %4257 = vmatmul.mubr.msk.f32.vlgmr.msra.gmra.mxu1 %vm41_vm0, %v3469_v63 }
0x1182   :  { %v4258_v1 = vpop.f32.mrf.mxu1 }
0x1183   :  { %v3564_v3 = vadd.f32 %v4258_v1, %v3473_v0 }
0x1184   :  { %v3558_v4 = vpop.f32.mrf.mxu1 }
0x1185   :  { %v3559_v5 = vadd.f32 %v3558_v4, %v3473_v0  ;;  %v3568_v2 = vmax.f32 %v3564_v3, 0.0 }
0x1187   :  { %v3567_v7 = vmax.f32 %v3559_v5, 0.0 }
0x1189   :  { %4263 = vmatprep.mubr.msk.f32.mxu0 %vm1735_vm5, %v3567_v7 }
0x118a   :  { %4264 = vmatmul.mubr.msk.f32.vlgmr.msra.gmra.mxu0 %vm1735_vm5, %v3568_v2 }
0x118b   :  { %4267 = vmatpush3.xpose.msk.msra.mxu0 %vm41_vm0, %v3701_v35 }
0x118c   :  { %4268 = vmatprep.subr.msk.mxu0 %vm41_vm0, %v3700_v40 }
0x118f   :  { %4269 = vmatpush3.xpose.msk.msra.mxu0 %vm41_vm0, %v3700_v40 }
0x124a   :  { %v4265_v8 = vpop.f32.mrf.mxu0 }
0x124b   :  { %v3657_v12 = vadd.f32 %v4265_v8, %v3572_v6 }
0x124c   :  { %v3651_v13 = vpop.f32.mrf.mxu0 }
0x124d   :  { %v3661_v16 = vadd.f32 %v3657_v12, %v3469_v63  ;;  %v3652_v17 = vadd.f32 %v3651_v13, %v3572_v6 }
0x124f   :  { %v3660_v36 = vadd.f32 %v3652_v17, %v3468_v61  ;;  %v3665_v19 = vsel %vm41_vm0, %v3661_v16, 0.0 }
0x1250   :  { %3666 = vadd.xlane.f32.xlu0 %v3665_v19 }
0x1251   :  { %v3662_v24 = vsel %vm41_vm0, %v3660_v36, 0.0 }
0x1252   :  { %3663 = vadd.xlane.f32.xlu1 %v3662_v24 }
0x12d9   :  { %v3667_v25 = vpop.xlane.xlu0 %3666 }
0x12da   :  { %v3669_v26 = vmul.f32 0.0625, %v3667_v25 }
0x12db   :  { %v3664_v27 = vpop.xlane.xlu1 %3663 }
0x12dc   :  { %v3671_v28 = vsub.f32 %v3661_v16, %v3669_v26  ;;  %v3668_v38 = vmul.f32 0.0625, %v3664_v27 }
0x12de   :  { %v3670_v42 = vsub.f32 %v3660_v36, %v3668_v38  ;;  %v3673_v11 = vmul.f32 %v3671_v28, %v3671_v28 }
0x12e0   :  { %v3677_v44 = vsel %vm41_vm0, %v3673_v11, 0.0  ;;  %v3672_v32 = vmul.f32 %v3670_v42, %v3670_v42 }
0x12e1   :  { %3678 = vadd.xlane.f32.xlu0 %v3677_v44 }
0x12e2   :  { %v3674_v34 = vsel %vm41_vm0, %v3672_v32, 0.0 }
0x12e3   :  { %3675 = vadd.xlane.f32.xlu1 %v3674_v34 }
0x136a   :  { %v3679_v37 = vpop.xlane.xlu0 %3678 }
0x136b   :  { %v3681_v10 = vmul.f32 0.0625, %v3679_v37 }
0x136c   :  { %v3676_v33 = vpop.xlane.xlu1 %3675 }
0x136d   :  { %v3683_v41 = vadd.f32 1e-05, %v3681_v10  ;;  %v3680_v39 = vmul.f32 0.0625, %v3676_v33 }
0x136f   :  { %4359 = vrsqrt.f32 %v3683_v41  ;;  %v3682_v52 = vadd.f32 1e-05, %v3680_v39 }
0x1371   :  { %4361 = vrsqrt.f32 %v3682_v52 }
0x137c   :  { %v4360_v43 = vpop.eup %4359 }
0x137d   :  { %v3687_v46 = vmul.f32 %v4360_v43, %v3671_v28 }
0x137e   :  { %v4362_v30 = vpop.eup %4361 }
0x137f   :  { %v3686_v29 = vmul.f32 %v4362_v30, %v3670_v42  ;;  %v3693_v47 = vmul.f32 %v3691_v45, %v3687_v46 }
0x1381   :  { %v3692_v49 = vmul.f32 %v3691_v45, %v3686_v29  ;;  %v3699_v51 = vadd.f32 %v3697_v48, %v3693_v47 }
0x1383   :  { %v3698_v50 = vadd.f32 %v3697_v48, %v3692_v49 }
0x1385   :  { %4270 = vmatprep.mubr.msk.f32.mxu0 %vm41_vm0, %v3698_v50 }
0x1386   :  { %4271 = vmatmul.mubr.msk.f32.vlgmr.msra.gmra.mxu0 %vm41_vm0, %v3699_v51 }
0x1446   :  { %v4272_v15 = vpop.f32.mrf.mxu0 }
0x1447   :  { %v3793_v54 = vadd.f32 %v4272_v15, %v3909_v53 }
0x1448   :  { %v3787_v55 = vpop.f32.mrf.mxu0 }
0x1449   :  { %3797 = vst.msk [vmem:[%s5057_s5 + $0x8] sm:$0xff] %vm41_vm0, %v3793_v54  ;;  %v3788_v9 = vadd.f32 %v3909_v53, %v3787_v55 }
0x144b   :  { %3796 = vst.msk [vmem:[%s5057_s5] sm:$0xff] %vm41_vm0, %v3788_v9 }

</bundles_post_ra>
